<compile_context>
chip_gen: v6e
topology: v6e:2x2x1
jax: 0.10.0
libtpu: 0.0.40
codegen_flags: <defaults>
</compile_context>

<pallas_src>
import jax
import jax.numpy as jnp
from jax.experimental import pallas as pl
from jax.experimental.pallas import tpu as pltpu

IN_DIM = 45
HID = 128
FC1 = 32
OUT = 2


def gru_net_kernel(x_ref, wih_ref, bgx_ref, whh_ref, bhn_ref,
                   w1_ref, b1_ref, w2_ref, b2_ref, out_ref):
    """Fused input projection + GRU recurrence + FC head in one invocation.

    x_ref  : (T*Bp, DP)  time-major, batch- and feature-padded raw input.
    wih_ref: (DP, 3*HID) input weight, pre-transposed, feature-padded.
    bgx_ref: (1, 3*HID)  b_ih + [b_hh_r, b_hh_z, 0] folded projection bias.
    whh_ref: (HID, 3*HID) recurrent weight, pre-transposed, bf16.
    bhn_ref: (1, HID)    b_hh of the n gate (must stay inside r * (...)).
    """
    Bp = out_ref.shape[0]
    T = x_ref.shape[0] // Bp

    # Fused input projection: one matmul over all (t, b) pairs, off the serial
    # h chain (the per-step slices below are plain sublane-aligned reads).
    gx_all = jnp.dot(x_ref[...], wih_ref[...],
                     preferred_element_type=jnp.float32) + bgx_ref[...]

    # Hoist the loop-invariant broadcast (JAX does not CSE broadcast_in_dim).
    b_hn = jnp.broadcast_to(bhn_ref[...], (Bp, HID))

    # Hidden state lives in vregs for the whole recurrence.
    h = jnp.zeros((Bp, HID), jnp.float32)

    # Fully unrolled time loop (T is a small static constant).
    for t in range(T):
        gx = gx_all[t * Bp:(t + 1) * Bp, :]                 # (Bp, 3*HID)
        h16 = h.astype(jnp.bfloat16)
        # Per-gate column slices re-loaded from VMEM each step (no 24-vreg
        # live W_hh across the unrolled loop); [r,z] block first so its
        # sigmoids overlap the n block drain.
        gh_rz = jnp.dot(h16, whh_ref[:, :2 * HID],
                        preferred_element_type=jnp.float32)  # (Bp, 2*HID)
        gh_n = jnp.dot(h16, whh_ref[:, 2 * HID:],
                       preferred_element_type=jnp.float32)   # (Bp, HID)
        # PyTorch gate order: [r, z, n].
        r = jax.nn.sigmoid(gx[:, :HID] + gh_rz[:, :HID])
        z = jax.nn.sigmoid(gx[:, HID:2 * HID] + gh_rz[:, HID:])
        n = jnp.tanh(gx[:, 2 * HID:] + r * (gh_n + b_hn))
        h = (1.0 - z) * n + z * h

    # Fused head: relu(h_T) -> fc1 -> relu -> fc2.
    hr = jnp.maximum(h, 0.0)
    y1 = jnp.dot(hr, w1_ref[...], preferred_element_type=jnp.float32) + b1_ref[...]
    y1 = jnp.maximum(y1, 0.0)
    y2 = jnp.dot(y1, w2_ref[...], preferred_element_type=jnp.float32) + b2_ref[...]
    out_ref[...] = y2.astype(out_ref.dtype)


def prepare_params(torch_params):
    """PyTorch-layout params -> kernel layout (fold biases, transpose, pad)."""
    wih, whh, bih, bhh, w1, b1, w2, b2 = torch_params
    dp = ((IN_DIM + 7) // 8) * 8                      # pad feature dim 45 -> 48
    wih_t = jnp.zeros((dp, 3 * HID), jnp.float32).at[:IN_DIM, :].set(wih.T)
    # Fold b_ih (all gates) + the r/z slices of b_hh into the projection bias;
    # keep b_hh_n separate (it sits inside r * (...)).
    b_gx = bih + jnp.concatenate([bhh[:2 * HID], jnp.zeros((HID,), bhh.dtype)])
    return dict(
        wih_t=wih_t,                                  # (48, 3*HID) f32
        b_gx=b_gx[None, :].astype(jnp.float32),       # (1, 3*HID)
        whh_t=whh.T.astype(jnp.bfloat16),             # (HID, 3*HID) bf16
        b_hn=bhh[2 * HID:][None, :].astype(jnp.float32),   # (1, HID)
        w1_t=w1.T, b1=b1[None, :],                    # (HID, FC1), (1, FC1)
        w2_t=w2.T, b2=b2[None, :],                    # (FC1, OUT), (1, OUT)
    )


def net_forward(x, p):
    """x: (B, T, 45) batch_first, like the PyTorch module. Returns (B, 2)."""
    B, T, D = x.shape
    assert D == IN_DIM
    x = x.astype(jnp.float32)

    Bp = ((B + 7) // 8) * 8              # pad batch to 8 sublanes
    DP = p['wih_t'].shape[0]             # padded feature dim (48)

    # Only tiny layout plumbing on raw x (no einsum, no gx HBM round-trip):
    # time-major transpose + single zero-pad + free reshape.
    xt = jnp.transpose(x, (1, 0, 2))                       # (T, B, 45)
    xt = jnp.pad(xt, ((0, 0), (0, Bp - B), (0, DP - D)))   # (T, Bp, 48)
    x2d = xt.reshape(T * Bp, DP)

    vmem = lambda: pl.BlockSpec(memory_space=pltpu.MemorySpace.VMEM)
    out = pl.pallas_call(
        gru_net_kernel,
        out_shape=jax.ShapeDtypeStruct((Bp, OUT), jnp.float32),
        in_specs=[vmem() for _ in range(9)],
        out_specs=vmem(),
    )(x2d, p['wih_t'], p['b_gx'], p['whh_t'], p['b_hn'],
      p['w1_t'], p['b1'], p['w2_t'], p['b2'])
    return out[:B]


def init_params(key):
    """PyTorch-convention parameter shapes/init."""
    ks = jax.random.split(key, 8)
    k_gru = 1.0 / jnp.sqrt(jnp.float32(HID))
    k_fc1 = 1.0 / jnp.sqrt(jnp.float32(HID))
    k_fc2 = 1.0 / jnp.sqrt(jnp.float32(FC1))
    u = lambda k, shape, s: jax.random.uniform(k, shape, jnp.float32, -s, s)
    wih = u(ks[0], (3 * HID, IN_DIM), k_gru)   # weight_ih_l0 (384, 45)
    whh = u(ks[1], (3 * HID, HID), k_gru)      # weight_hh_l0 (384, 128)
    bih = u(ks[2], (3 * HID,), k_gru)
    bhh = u(ks[3], (3 * HID,), k_gru)
    w1 = u(ks[4], (FC1, HID), k_fc1)           # fc1.weight (32, 128)
    b1 = u(ks[5], (FC1,), k_fc1)
    w2 = u(ks[6], (OUT, FC1), k_fc2)           # fc2.weight (2, 32)
    b2 = u(ks[7], (OUT,), k_fc2)
    return (wih, whh, bih, bhh, w1, b1, w2, b2)


def reference_forward(x, torch_params):
    """Pure-JAX f32 reference of the PyTorch forward (unfolded biases)."""
    wih, whh, bih, bhh, w1, b1, w2, b2 = torch_params
    B, T, _ = x.shape
    h = jnp.zeros((B, HID), jnp.float32)
    for t in range(T):
        gi = x[:, t, :] @ wih.T + bih
        gh = h @ whh.T + bhh
        r = jax.nn.sigmoid(gi[:, :HID] + gh[:, :HID])
        z = jax.nn.sigmoid(gi[:, HID:2 * HID] + gh[:, HID:2 * HID])
        n = jnp.tanh(gi[:, 2 * HID:] + r * gh[:, 2 * HID:])
        h = (1.0 - z) * n + z * h
    hr = jnp.maximum(h, 0.0)
    y1 = jnp.maximum(hr @ w1.T + b1, 0.0)
    return y1 @ w2.T + b2


if __name__ == "__main__":
    key = jax.random.PRNGKey(0)
    kp, kx = jax.random.split(key)
    torch_params = init_params(kp)
    params = prepare_params(torch_params)

    B, T = 2, 8
    x = jax.random.normal(kx, (B, T, IN_DIM), jnp.float32)

    fwd = jax.jit(net_forward)
    out = jax.block_until_ready(fwd(x, params))

    ref = reference_forward(x, torch_params)
    assert out.shape == (B, OUT)
    # Tolerance relaxed vs the f32 reference because the recurrent matmul
    # operands are bf16 (f32 accumulation); error stays well below this.
    assert jnp.max(jnp.abs(out - ref)) < 2e-2, "mismatch vs reference"

    print("KERNEL_OK")
</pallas_src>

<mosaic_0001>
module attributes {stable_mosaic.version = 11 : i64} {
  func.func @gru_net_kernel(%arg0: memref<64x48xf32, #tpu.memory_space<vmem>>, %arg1: memref<48x384xf32, #tpu.memory_space<vmem>>, %arg2: memref<1x384xf32, #tpu.memory_space<vmem>>, %arg3: memref<128x384xbf16, #tpu.memory_space<vmem>>, %arg4: memref<1x128xf32, #tpu.memory_space<vmem>>, %arg5: memref<128x32xf32, #tpu.memory_space<vmem>>, %arg6: memref<1x32xf32, #tpu.memory_space<vmem>>, %arg7: memref<32x2xf32, #tpu.memory_space<vmem>>, %arg8: memref<1x2xf32, #tpu.memory_space<vmem>>, %arg9: memref<8x2xf32, #tpu.memory_space<vmem>>) attributes {dimension_semantics = [], scalar_prefetch = 0 : i64, scratch_operands = 0 : i64, tpu.core_type = #tpu.core_type<tc>} {
    %c0 = arith.constant 0 : index
    %c0_0 = arith.constant 0 : index
    %0 = vector.load %arg0[%c0, %c0_0] : memref<64x48xf32, #tpu.memory_space<vmem>>, vector<64x48xf32>
    %c0_1 = arith.constant 0 : index
    %c0_2 = arith.constant 0 : index
    %1 = vector.load %arg1[%c0_1, %c0_2] : memref<48x384xf32, #tpu.memory_space<vmem>>, vector<48x384xf32>
    %cst = arith.constant dense<0.000000e+00> : vector<64x384xf32>
    %2 = tpu.matmul %0, %1, %cst {dimension_numbers = #tpu.dot_dimension_numbers<[1], [0], [0], [1], [0, 0, 1, 1], [], []>} : vector<64x48xf32>, vector<48x384xf32>, vector<64x384xf32> -> vector<64x384xf32>
    %c0_3 = arith.constant 0 : index
    %c0_4 = arith.constant 0 : index
    %3 = vector.load %arg2[%c0_3, %c0_4] : memref<1x384xf32, #tpu.memory_space<vmem>>, vector<1x384xf32>
    %4 = vector.broadcast %3 : vector<1x384xf32> to vector<64x384xf32>
    %5 = arith.addf %2, %4 : vector<64x384xf32>
    %c0_5 = arith.constant 0 : index
    %c0_6 = arith.constant 0 : index
    %6 = vector.load %arg4[%c0_5, %c0_6] : memref<1x128xf32, #tpu.memory_space<vmem>>, vector<1x128xf32>
    %7 = vector.shape_cast %6 : vector<1x128xf32> to vector<1x128xf32>
    %8 = vector.broadcast %7 : vector<1x128xf32> to vector<8x128xf32>
    %cst_7 = arith.constant 0.000000e+00 : f32
    %9 = vector.broadcast %cst_7 : f32 to vector<8x128xf32>
    %10 = vector.extract_strided_slice %5 {offsets = [0, 0], sizes = [8, 384], strides = [1, 1]} : vector<64x384xf32> to vector<8x384xf32>
    %11 = arith.truncf %9 : vector<8x128xf32> to vector<8x128xbf16>
    %c0_8 = arith.constant 0 : index
    %c0_9 = arith.constant 0 : index
    %12 = vector.load %arg3[%c0_8, %c0_9] : memref<128x384xbf16, #tpu.memory_space<vmem>>, vector<128x256xbf16>
    %cst_10 = arith.constant dense<0.000000e+00> : vector<8x256xf32>
    %13 = tpu.matmul %11, %12, %cst_10 {dimension_numbers = #tpu.dot_dimension_numbers<[1], [0], [0], [1], [0, 0, 1, 1], [], []>} : vector<8x128xbf16>, vector<128x256xbf16>, vector<8x256xf32> -> vector<8x256xf32>
    %c0_11 = arith.constant 0 : index
    %c256 = arith.constant 256 : index
    %14 = vector.load %arg3[%c0_11, %c256] : memref<128x384xbf16, #tpu.memory_space<vmem>>, vector<128x128xbf16>
    %cst_12 = arith.constant dense<0.000000e+00> : vector<8x128xf32>
    %15 = tpu.matmul %11, %14, %cst_12 {dimension_numbers = #tpu.dot_dimension_numbers<[1], [0], [0], [1], [0, 0, 1, 1], [], []>} : vector<8x128xbf16>, vector<128x128xbf16>, vector<8x128xf32> -> vector<8x128xf32>
    %16 = vector.extract_strided_slice %10 {offsets = [0, 0], sizes = [8, 128], strides = [1, 1]} : vector<8x384xf32> to vector<8x128xf32>
    %17 = vector.extract_strided_slice %13 {offsets = [0, 0], sizes = [8, 128], strides = [1, 1]} : vector<8x256xf32> to vector<8x128xf32>
    %18 = arith.addf %16, %17 : vector<8x128xf32>
    %19 = arith.negf %18 : vector<8x128xf32>
    %20 = math.exp %19 : vector<8x128xf32>
    %cst_13 = arith.constant 1.000000e+00 : f32
    %21 = vector.broadcast %cst_13 : f32 to vector<8x128xf32>
    %22 = arith.addf %21, %20 : vector<8x128xf32>
    %23 = arith.divf %21, %22 : vector<8x128xf32>
    %24 = vector.extract_strided_slice %10 {offsets = [0, 128], sizes = [8, 128], strides = [1, 1]} : vector<8x384xf32> to vector<8x128xf32>
    %25 = vector.extract_strided_slice %13 {offsets = [0, 128], sizes = [8, 128], strides = [1, 1]} : vector<8x256xf32> to vector<8x128xf32>
    %26 = arith.addf %24, %25 : vector<8x128xf32>
    %27 = arith.negf %26 : vector<8x128xf32>
    %28 = math.exp %27 : vector<8x128xf32>
    %cst_14 = arith.constant 1.000000e+00 : f32
    %29 = vector.broadcast %cst_14 : f32 to vector<8x128xf32>
    %30 = arith.addf %29, %28 : vector<8x128xf32>
    %31 = arith.divf %29, %30 : vector<8x128xf32>
    %32 = vector.extract_strided_slice %10 {offsets = [0, 256], sizes = [8, 128], strides = [1, 1]} : vector<8x384xf32> to vector<8x128xf32>
    %33 = arith.addf %15, %8 : vector<8x128xf32>
    %34 = arith.mulf %23, %33 : vector<8x128xf32>
    %35 = arith.addf %32, %34 : vector<8x128xf32>
    %36 = math.tanh %35 : vector<8x128xf32>
    %cst_15 = arith.constant 1.000000e+00 : f32
    %37 = vector.broadcast %cst_15 : f32 to vector<8x128xf32>
    %38 = arith.subf %37, %31 : vector<8x128xf32>
    %39 = arith.mulf %38, %36 : vector<8x128xf32>
    %40 = arith.mulf %31, %9 : vector<8x128xf32>
    %41 = arith.addf %39, %40 : vector<8x128xf32>
    %42 = vector.extract_strided_slice %5 {offsets = [8, 0], sizes = [8, 384], strides = [1, 1]} : vector<64x384xf32> to vector<8x384xf32>
    %43 = arith.truncf %41 : vector<8x128xf32> to vector<8x128xbf16>
    %c0_16 = arith.constant 0 : index
    %c0_17 = arith.constant 0 : index
    %44 = vector.load %arg3[%c0_16, %c0_17] : memref<128x384xbf16, #tpu.memory_space<vmem>>, vector<128x256xbf16>
    %cst_18 = arith.constant dense<0.000000e+00> : vector<8x256xf32>
    %45 = tpu.matmul %43, %44, %cst_18 {dimension_numbers = #tpu.dot_dimension_numbers<[1], [0], [0], [1], [0, 0, 1, 1], [], []>} : vector<8x128xbf16>, vector<128x256xbf16>, vector<8x256xf32> -> vector<8x256xf32>
    %c0_19 = arith.constant 0 : index
    %c256_20 = arith.constant 256 : index
    %46 = vector.load %arg3[%c0_19, %c256_20] : memref<128x384xbf16, #tpu.memory_space<vmem>>, vector<128x128xbf16>
    %cst_21 = arith.constant dense<0.000000e+00> : vector<8x128xf32>
    %47 = tpu.matmul %43, %46, %cst_21 {dimension_numbers = #tpu.dot_dimension_numbers<[1], [0], [0], [1], [0, 0, 1, 1], [], []>} : vector<8x128xbf16>, vector<128x128xbf16>, vector<8x128xf32> -> vector<8x128xf32>
    %48 = vector.extract_strided_slice %42 {offsets = [0, 0], sizes = [8, 128], strides = [1, 1]} : vector<8x384xf32> to vector<8x128xf32>
    %49 = vector.extract_strided_slice %45 {offsets = [0, 0], sizes = [8, 128], strides = [1, 1]} : vector<8x256xf32> to vector<8x128xf32>
    %50 = arith.addf %48, %49 : vector<8x128xf32>
    %51 = arith.negf %50 : vector<8x128xf32>
    %52 = math.exp %51 : vector<8x128xf32>
    %cst_22 = arith.constant 1.000000e+00 : f32
    %53 = vector.broadcast %cst_22 : f32 to vector<8x128xf32>
    %54 = arith.addf %53, %52 : vector<8x128xf32>
    %55 = arith.divf %53, %54 : vector<8x128xf32>
    %56 = vector.extract_strided_slice %42 {offsets = [0, 128], sizes = [8, 128], strides = [1, 1]} : vector<8x384xf32> to vector<8x128xf32>
    %57 = vector.extract_strided_slice %45 {offsets = [0, 128], sizes = [8, 128], strides = [1, 1]} : vector<8x256xf32> to vector<8x128xf32>
    %58 = arith.addf %56, %57 : vector<8x128xf32>
    %59 = arith.negf %58 : vector<8x128xf32>
    %60 = math.exp %59 : vector<8x128xf32>
    %cst_23 = arith.constant 1.000000e+00 : f32
    %61 = vector.broadcast %cst_23 : f32 to vector<8x128xf32>
    %62 = arith.addf %61, %60 : vector<8x128xf32>
    %63 = arith.divf %61, %62 : vector<8x128xf32>
    %64 = vector.extract_strided_slice %42 {offsets = [0, 256], sizes = [8, 128], strides = [1, 1]} : vector<8x384xf32> to vector<8x128xf32>
    %65 = arith.addf %47, %8 : vector<8x128xf32>
    %66 = arith.mulf %55, %65 : vector<8x128xf32>
    %67 = arith.addf %64, %66 : vector<8x128xf32>
    %68 = math.tanh %67 : vector<8x128xf32>
    %cst_24 = arith.constant 1.000000e+00 : f32
    %69 = vector.broadcast %cst_24 : f32 to vector<8x128xf32>
    %70 = arith.subf %69, %63 : vector<8x128xf32>
    %71 = arith.mulf %70, %68 : vector<8x128xf32>
    %72 = arith.mulf %63, %41 : vector<8x128xf32>
    %73 = arith.addf %71, %72 : vector<8x128xf32>
    %74 = vector.extract_strided_slice %5 {offsets = [16, 0], sizes = [8, 384], strides = [1, 1]} : vector<64x384xf32> to vector<8x384xf32>
    %75 = arith.truncf %73 : vector<8x128xf32> to vector<8x128xbf16>
    %c0_25 = arith.constant 0 : index
    %c0_26 = arith.constant 0 : index
    %76 = vector.load %arg3[%c0_25, %c0_26] : memref<128x384xbf16, #tpu.memory_space<vmem>>, vector<128x256xbf16>
    %cst_27 = arith.constant dense<0.000000e+00> : vector<8x256xf32>
    %77 = tpu.matmul %75, %76, %cst_27 {dimension_numbers = #tpu.dot_dimension_numbers<[1], [0], [0], [1], [0, 0, 1, 1], [], []>} : vector<8x128xbf16>, vector<128x256xbf16>, vector<8x256xf32> -> vector<8x256xf32>
    %c0_28 = arith.constant 0 : index
    %c256_29 = arith.constant 256 : index
    %78 = vector.load %arg3[%c0_28, %c256_29] : memref<128x384xbf16, #tpu.memory_space<vmem>>, vector<128x128xbf16>
    %cst_30 = arith.constant dense<0.000000e+00> : vector<8x128xf32>
    %79 = tpu.matmul %75, %78, %cst_30 {dimension_numbers = #tpu.dot_dimension_numbers<[1], [0], [0], [1], [0, 0, 1, 1], [], []>} : vector<8x128xbf16>, vector<128x128xbf16>, vector<8x128xf32> -> vector<8x128xf32>
    %80 = vector.extract_strided_slice %74 {offsets = [0, 0], sizes = [8, 128], strides = [1, 1]} : vector<8x384xf32> to vector<8x128xf32>
    %81 = vector.extract_strided_slice %77 {offsets = [0, 0], sizes = [8, 128], strides = [1, 1]} : vector<8x256xf32> to vector<8x128xf32>
    %82 = arith.addf %80, %81 : vector<8x128xf32>
    %83 = arith.negf %82 : vector<8x128xf32>
    %84 = math.exp %83 : vector<8x128xf32>
    %cst_31 = arith.constant 1.000000e+00 : f32
    %85 = vector.broadcast %cst_31 : f32 to vector<8x128xf32>
    %86 = arith.addf %85, %84 : vector<8x128xf32>
    %87 = arith.divf %85, %86 : vector<8x128xf32>
    %88 = vector.extract_strided_slice %74 {offsets = [0, 128], sizes = [8, 128], strides = [1, 1]} : vector<8x384xf32> to vector<8x128xf32>
    %89 = vector.extract_strided_slice %77 {offsets = [0, 128], sizes = [8, 128], strides = [1, 1]} : vector<8x256xf32> to vector<8x128xf32>
    %90 = arith.addf %88, %89 : vector<8x128xf32>
    %91 = arith.negf %90 : vector<8x128xf32>
    %92 = math.exp %91 : vector<8x128xf32>
    %cst_32 = arith.constant 1.000000e+00 : f32
    %93 = vector.broadcast %cst_32 : f32 to vector<8x128xf32>
    %94 = arith.addf %93, %92 : vector<8x128xf32>
    %95 = arith.divf %93, %94 : vector<8x128xf32>
    %96 = vector.extract_strided_slice %74 {offsets = [0, 256], sizes = [8, 128], strides = [1, 1]} : vector<8x384xf32> to vector<8x128xf32>
    %97 = arith.addf %79, %8 : vector<8x128xf32>
    %98 = arith.mulf %87, %97 : vector<8x128xf32>
    %99 = arith.addf %96, %98 : vector<8x128xf32>
    %100 = math.tanh %99 : vector<8x128xf32>
    %cst_33 = arith.constant 1.000000e+00 : f32
    %101 = vector.broadcast %cst_33 : f32 to vector<8x128xf32>
    %102 = arith.subf %101, %95 : vector<8x128xf32>
    %103 = arith.mulf %102, %100 : vector<8x128xf32>
    %104 = arith.mulf %95, %73 : vector<8x128xf32>
    %105 = arith.addf %103, %104 : vector<8x128xf32>
    %106 = vector.extract_strided_slice %5 {offsets = [24, 0], sizes = [8, 384], strides = [1, 1]} : vector<64x384xf32> to vector<8x384xf32>
    %107 = arith.truncf %105 : vector<8x128xf32> to vector<8x128xbf16>
    %c0_34 = arith.constant 0 : index
    %c0_35 = arith.constant 0 : index
    %108 = vector.load %arg3[%c0_34, %c0_35] : memref<128x384xbf16, #tpu.memory_space<vmem>>, vector<128x256xbf16>
    %cst_36 = arith.constant dense<0.000000e+00> : vector<8x256xf32>
    %109 = tpu.matmul %107, %108, %cst_36 {dimension_numbers = #tpu.dot_dimension_numbers<[1], [0], [0], [1], [0, 0, 1, 1], [], []>} : vector<8x128xbf16>, vector<128x256xbf16>, vector<8x256xf32> -> vector<8x256xf32>
    %c0_37 = arith.constant 0 : index
    %c256_38 = arith.constant 256 : index
    %110 = vector.load %arg3[%c0_37, %c256_38] : memref<128x384xbf16, #tpu.memory_space<vmem>>, vector<128x128xbf16>
    %cst_39 = arith.constant dense<0.000000e+00> : vector<8x128xf32>
    %111 = tpu.matmul %107, %110, %cst_39 {dimension_numbers = #tpu.dot_dimension_numbers<[1], [0], [0], [1], [0, 0, 1, 1], [], []>} : vector<8x128xbf16>, vector<128x128xbf16>, vector<8x128xf32> -> vector<8x128xf32>
    %112 = vector.extract_strided_slice %106 {offsets = [0, 0], sizes = [8, 128], strides = [1, 1]} : vector<8x384xf32> to vector<8x128xf32>
    %113 = vector.extract_strided_slice %109 {offsets = [0, 0], sizes = [8, 128], strides = [1, 1]} : vector<8x256xf32> to vector<8x128xf32>
    %114 = arith.addf %112, %113 : vector<8x128xf32>
    %115 = arith.negf %114 : vector<8x128xf32>
    %116 = math.exp %115 : vector<8x128xf32>
    %cst_40 = arith.constant 1.000000e+00 : f32
    %117 = vector.broadcast %cst_40 : f32 to vector<8x128xf32>
    %118 = arith.addf %117, %116 : vector<8x128xf32>
    %119 = arith.divf %117, %118 : vector<8x128xf32>
    %120 = vector.extract_strided_slice %106 {offsets = [0, 128], sizes = [8, 128], strides = [1, 1]} : vector<8x384xf32> to vector<8x128xf32>
    %121 = vector.extract_strided_slice %109 {offsets = [0, 128], sizes = [8, 128], strides = [1, 1]} : vector<8x256xf32> to vector<8x128xf32>
    %122 = arith.addf %120, %121 : vector<8x128xf32>
    %123 = arith.negf %122 : vector<8x128xf32>
    %124 = math.exp %123 : vector<8x128xf32>
    %cst_41 = arith.constant 1.000000e+00 : f32
    %125 = vector.broadcast %cst_41 : f32 to vector<8x128xf32>
    %126 = arith.addf %125, %124 : vector<8x128xf32>
    %127 = arith.divf %125, %126 : vector<8x128xf32>
    %128 = vector.extract_strided_slice %106 {offsets = [0, 256], sizes = [8, 128], strides = [1, 1]} : vector<8x384xf32> to vector<8x128xf32>
    %129 = arith.addf %111, %8 : vector<8x128xf32>
    %130 = arith.mulf %119, %129 : vector<8x128xf32>
    %131 = arith.addf %128, %130 : vector<8x128xf32>
    %132 = math.tanh %131 : vector<8x128xf32>
    %cst_42 = arith.constant 1.000000e+00 : f32
    %133 = vector.broadcast %cst_42 : f32 to vector<8x128xf32>
    %134 = arith.subf %133, %127 : vector<8x128xf32>
    %135 = arith.mulf %134, %132 : vector<8x128xf32>
    %136 = arith.mulf %127, %105 : vector<8x128xf32>
    %137 = arith.addf %135, %136 : vector<8x128xf32>
    %138 = vector.extract_strided_slice %5 {offsets = [32, 0], sizes = [8, 384], strides = [1, 1]} : vector<64x384xf32> to vector<8x384xf32>
    %139 = arith.truncf %137 : vector<8x128xf32> to vector<8x128xbf16>
    %c0_43 = arith.constant 0 : index
    %c0_44 = arith.constant 0 : index
    %140 = vector.load %arg3[%c0_43, %c0_44] : memref<128x384xbf16, #tpu.memory_space<vmem>>, vector<128x256xbf16>
    %cst_45 = arith.constant dense<0.000000e+00> : vector<8x256xf32>
    %141 = tpu.matmul %139, %140, %cst_45 {dimension_numbers = #tpu.dot_dimension_numbers<[1], [0], [0], [1], [0, 0, 1, 1], [], []>} : vector<8x128xbf16>, vector<128x256xbf16>, vector<8x256xf32> -> vector<8x256xf32>
    %c0_46 = arith.constant 0 : index
    %c256_47 = arith.constant 256 : index
    %142 = vector.load %arg3[%c0_46, %c256_47] : memref<128x384xbf16, #tpu.memory_space<vmem>>, vector<128x128xbf16>
    %cst_48 = arith.constant dense<0.000000e+00> : vector<8x128xf32>
    %143 = tpu.matmul %139, %142, %cst_48 {dimension_numbers = #tpu.dot_dimension_numbers<[1], [0], [0], [1], [0, 0, 1, 1], [], []>} : vector<8x128xbf16>, vector<128x128xbf16>, vector<8x128xf32> -> vector<8x128xf32>
    %144 = vector.extract_strided_slice %138 {offsets = [0, 0], sizes = [8, 128], strides = [1, 1]} : vector<8x384xf32> to vector<8x128xf32>
    %145 = vector.extract_strided_slice %141 {offsets = [0, 0], sizes = [8, 128], strides = [1, 1]} : vector<8x256xf32> to vector<8x128xf32>
    %146 = arith.addf %144, %145 : vector<8x128xf32>
    %147 = arith.negf %146 : vector<8x128xf32>
    %148 = math.exp %147 : vector<8x128xf32>
    %cst_49 = arith.constant 1.000000e+00 : f32
    %149 = vector.broadcast %cst_49 : f32 to vector<8x128xf32>
    %150 = arith.addf %149, %148 : vector<8x128xf32>
    %151 = arith.divf %149, %150 : vector<8x128xf32>
    %152 = vector.extract_strided_slice %138 {offsets = [0, 128], sizes = [8, 128], strides = [1, 1]} : vector<8x384xf32> to vector<8x128xf32>
    %153 = vector.extract_strided_slice %141 {offsets = [0, 128], sizes = [8, 128], strides = [1, 1]} : vector<8x256xf32> to vector<8x128xf32>
    %154 = arith.addf %152, %153 : vector<8x128xf32>
    %155 = arith.negf %154 : vector<8x128xf32>
    %156 = math.exp %155 : vector<8x128xf32>
    %cst_50 = arith.constant 1.000000e+00 : f32
    %157 = vector.broadcast %cst_50 : f32 to vector<8x128xf32>
    %158 = arith.addf %157, %156 : vector<8x128xf32>
    %159 = arith.divf %157, %158 : vector<8x128xf32>
    %160 = vector.extract_strided_slice %138 {offsets = [0, 256], sizes = [8, 128], strides = [1, 1]} : vector<8x384xf32> to vector<8x128xf32>
    %161 = arith.addf %143, %8 : vector<8x128xf32>
    %162 = arith.mulf %151, %161 : vector<8x128xf32>
    %163 = arith.addf %160, %162 : vector<8x128xf32>
    %164 = math.tanh %163 : vector<8x128xf32>
    %cst_51 = arith.constant 1.000000e+00 : f32
    %165 = vector.broadcast %cst_51 : f32 to vector<8x128xf32>
    %166 = arith.subf %165, %159 : vector<8x128xf32>
    %167 = arith.mulf %166, %164 : vector<8x128xf32>
    %168 = arith.mulf %159, %137 : vector<8x128xf32>
    %169 = arith.addf %167, %168 : vector<8x128xf32>
    %170 = vector.extract_strided_slice %5 {offsets = [40, 0], sizes = [8, 384], strides = [1, 1]} : vector<64x384xf32> to vector<8x384xf32>
    %171 = arith.truncf %169 : vector<8x128xf32> to vector<8x128xbf16>
    %c0_52 = arith.constant 0 : index
    %c0_53 = arith.constant 0 : index
    %172 = vector.load %arg3[%c0_52, %c0_53] : memref<128x384xbf16, #tpu.memory_space<vmem>>, vector<128x256xbf16>
    %cst_54 = arith.constant dense<0.000000e+00> : vector<8x256xf32>
    %173 = tpu.matmul %171, %172, %cst_54 {dimension_numbers = #tpu.dot_dimension_numbers<[1], [0], [0], [1], [0, 0, 1, 1], [], []>} : vector<8x128xbf16>, vector<128x256xbf16>, vector<8x256xf32> -> vector<8x256xf32>
    %c0_55 = arith.constant 0 : index
    %c256_56 = arith.constant 256 : index
    %174 = vector.load %arg3[%c0_55, %c256_56] : memref<128x384xbf16, #tpu.memory_space<vmem>>, vector<128x128xbf16>
    %cst_57 = arith.constant dense<0.000000e+00> : vector<8x128xf32>
    %175 = tpu.matmul %171, %174, %cst_57 {dimension_numbers = #tpu.dot_dimension_numbers<[1], [0], [0], [1], [0, 0, 1, 1], [], []>} : vector<8x128xbf16>, vector<128x128xbf16>, vector<8x128xf32> -> vector<8x128xf32>
    %176 = vector.extract_strided_slice %170 {offsets = [0, 0], sizes = [8, 128], strides = [1, 1]} : vector<8x384xf32> to vector<8x128xf32>
    %177 = vector.extract_strided_slice %173 {offsets = [0, 0], sizes = [8, 128], strides = [1, 1]} : vector<8x256xf32> to vector<8x128xf32>
    %178 = arith.addf %176, %177 : vector<8x128xf32>
    %179 = arith.negf %178 : vector<8x128xf32>
    %180 = math.exp %179 : vector<8x128xf32>
    %cst_58 = arith.constant 1.000000e+00 : f32
    %181 = vector.broadcast %cst_58 : f32 to vector<8x128xf32>
    %182 = arith.addf %181, %180 : vector<8x128xf32>
    %183 = arith.divf %181, %182 : vector<8x128xf32>
    %184 = vector.extract_strided_slice %170 {offsets = [0, 128], sizes = [8, 128], strides = [1, 1]} : vector<8x384xf32> to vector<8x128xf32>
    %185 = vector.extract_strided_slice %173 {offsets = [0, 128], sizes = [8, 128], strides = [1, 1]} : vector<8x256xf32> to vector<8x128xf32>
    %186 = arith.addf %184, %185 : vector<8x128xf32>
    %187 = arith.negf %186 : vector<8x128xf32>
    %188 = math.exp %187 : vector<8x128xf32>
    %cst_59 = arith.constant 1.000000e+00 : f32
    %189 = vector.broadcast %cst_59 : f32 to vector<8x128xf32>
    %190 = arith.addf %189, %188 : vector<8x128xf32>
    %191 = arith.divf %189, %190 : vector<8x128xf32>
    %192 = vector.extract_strided_slice %170 {offsets = [0, 256], sizes = [8, 128], strides = [1, 1]} : vector<8x384xf32> to vector<8x128xf32>
    %193 = arith.addf %175, %8 : vector<8x128xf32>
    %194 = arith.mulf %183, %193 : vector<8x128xf32>
    %195 = arith.addf %192, %194 : vector<8x128xf32>
    %196 = math.tanh %195 : vector<8x128xf32>
    %cst_60 = arith.constant 1.000000e+00 : f32
    %197 = vector.broadcast %cst_60 : f32 to vector<8x128xf32>
    %198 = arith.subf %197, %191 : vector<8x128xf32>
    %199 = arith.mulf %198, %196 : vector<8x128xf32>
    %200 = arith.mulf %191, %169 : vector<8x128xf32>
    %201 = arith.addf %199, %200 : vector<8x128xf32>
    %202 = vector.extract_strided_slice %5 {offsets = [48, 0], sizes = [8, 384], strides = [1, 1]} : vector<64x384xf32> to vector<8x384xf32>
    %203 = arith.truncf %201 : vector<8x128xf32> to vector<8x128xbf16>
    %c0_61 = arith.constant 0 : index
    %c0_62 = arith.constant 0 : index
    %204 = vector.load %arg3[%c0_61, %c0_62] : memref<128x384xbf16, #tpu.memory_space<vmem>>, vector<128x256xbf16>
    %cst_63 = arith.constant dense<0.000000e+00> : vector<8x256xf32>
    %205 = tpu.matmul %203, %204, %cst_63 {dimension_numbers = #tpu.dot_dimension_numbers<[1], [0], [0], [1], [0, 0, 1, 1], [], []>} : vector<8x128xbf16>, vector<128x256xbf16>, vector<8x256xf32> -> vector<8x256xf32>
    %c0_64 = arith.constant 0 : index
    %c256_65 = arith.constant 256 : index
    %206 = vector.load %arg3[%c0_64, %c256_65] : memref<128x384xbf16, #tpu.memory_space<vmem>>, vector<128x128xbf16>
    %cst_66 = arith.constant dense<0.000000e+00> : vector<8x128xf32>
    %207 = tpu.matmul %203, %206, %cst_66 {dimension_numbers = #tpu.dot_dimension_numbers<[1], [0], [0], [1], [0, 0, 1, 1], [], []>} : vector<8x128xbf16>, vector<128x128xbf16>, vector<8x128xf32> -> vector<8x128xf32>
    %208 = vector.extract_strided_slice %202 {offsets = [0, 0], sizes = [8, 128], strides = [1, 1]} : vector<8x384xf32> to vector<8x128xf32>
    %209 = vector.extract_strided_slice %205 {offsets = [0, 0], sizes = [8, 128], strides = [1, 1]} : vector<8x256xf32> to vector<8x128xf32>
    %210 = arith.addf %208, %209 : vector<8x128xf32>
    %211 = arith.negf %210 : vector<8x128xf32>
    %212 = math.exp %211 : vector<8x128xf32>
    %cst_67 = arith.constant 1.000000e+00 : f32
    %213 = vector.broadcast %cst_67 : f32 to vector<8x128xf32>
    %214 = arith.addf %213, %212 : vector<8x128xf32>
    %215 = arith.divf %213, %214 : vector<8x128xf32>
    %216 = vector.extract_strided_slice %202 {offsets = [0, 128], sizes = [8, 128], strides = [1, 1]} : vector<8x384xf32> to vector<8x128xf32>
    %217 = vector.extract_strided_slice %205 {offsets = [0, 128], sizes = [8, 128], strides = [1, 1]} : vector<8x256xf32> to vector<8x128xf32>
    %218 = arith.addf %216, %217 : vector<8x128xf32>
    %219 = arith.negf %218 : vector<8x128xf32>
    %220 = math.exp %219 : vector<8x128xf32>
    %cst_68 = arith.constant 1.000000e+00 : f32
    %221 = vector.broadcast %cst_68 : f32 to vector<8x128xf32>
    %222 = arith.addf %221, %220 : vector<8x128xf32>
    %223 = arith.divf %221, %222 : vector<8x128xf32>
    %224 = vector.extract_strided_slice %202 {offsets = [0, 256], sizes = [8, 128], strides = [1, 1]} : vector<8x384xf32> to vector<8x128xf32>
    %225 = arith.addf %207, %8 : vector<8x128xf32>
    %226 = arith.mulf %215, %225 : vector<8x128xf32>
    %227 = arith.addf %224, %226 : vector<8x128xf32>
    %228 = math.tanh %227 : vector<8x128xf32>
    %cst_69 = arith.constant 1.000000e+00 : f32
    %229 = vector.broadcast %cst_69 : f32 to vector<8x128xf32>
    %230 = arith.subf %229, %223 : vector<8x128xf32>
    %231 = arith.mulf %230, %228 : vector<8x128xf32>
    %232 = arith.mulf %223, %201 : vector<8x128xf32>
    %233 = arith.addf %231, %232 : vector<8x128xf32>
    %234 = vector.extract_strided_slice %5 {offsets = [56, 0], sizes = [8, 384], strides = [1, 1]} : vector<64x384xf32> to vector<8x384xf32>
    %235 = arith.truncf %233 : vector<8x128xf32> to vector<8x128xbf16>
    %c0_70 = arith.constant 0 : index
    %c0_71 = arith.constant 0 : index
    %236 = vector.load %arg3[%c0_70, %c0_71] : memref<128x384xbf16, #tpu.memory_space<vmem>>, vector<128x256xbf16>
    %cst_72 = arith.constant dense<0.000000e+00> : vector<8x256xf32>
    %237 = tpu.matmul %235, %236, %cst_72 {dimension_numbers = #tpu.dot_dimension_numbers<[1], [0], [0], [1], [0, 0, 1, 1], [], []>} : vector<8x128xbf16>, vector<128x256xbf16>, vector<8x256xf32> -> vector<8x256xf32>
    %c0_73 = arith.constant 0 : index
    %c256_74 = arith.constant 256 : index
    %238 = vector.load %arg3[%c0_73, %c256_74] : memref<128x384xbf16, #tpu.memory_space<vmem>>, vector<128x128xbf16>
    %cst_75 = arith.constant dense<0.000000e+00> : vector<8x128xf32>
    %239 = tpu.matmul %235, %238, %cst_75 {dimension_numbers = #tpu.dot_dimension_numbers<[1], [0], [0], [1], [0, 0, 1, 1], [], []>} : vector<8x128xbf16>, vector<128x128xbf16>, vector<8x128xf32> -> vector<8x128xf32>
    %240 = vector.extract_strided_slice %234 {offsets = [0, 0], sizes = [8, 128], strides = [1, 1]} : vector<8x384xf32> to vector<8x128xf32>
    %241 = vector.extract_strided_slice %237 {offsets = [0, 0], sizes = [8, 128], strides = [1, 1]} : vector<8x256xf32> to vector<8x128xf32>
    %242 = arith.addf %240, %241 : vector<8x128xf32>
    %243 = arith.negf %242 : vector<8x128xf32>
    %244 = math.exp %243 : vector<8x128xf32>
    %cst_76 = arith.constant 1.000000e+00 : f32
    %245 = vector.broadcast %cst_76 : f32 to vector<8x128xf32>
    %246 = arith.addf %245, %244 : vector<8x128xf32>
    %247 = arith.divf %245, %246 : vector<8x128xf32>
    %248 = vector.extract_strided_slice %234 {offsets = [0, 128], sizes = [8, 128], strides = [1, 1]} : vector<8x384xf32> to vector<8x128xf32>
    %249 = vector.extract_strided_slice %237 {offsets = [0, 128], sizes = [8, 128], strides = [1, 1]} : vector<8x256xf32> to vector<8x128xf32>
    %250 = arith.addf %248, %249 : vector<8x128xf32>
    %251 = arith.negf %250 : vector<8x128xf32>
    %252 = math.exp %251 : vector<8x128xf32>
    %cst_77 = arith.constant 1.000000e+00 : f32
    %253 = vector.broadcast %cst_77 : f32 to vector<8x128xf32>
    %254 = arith.addf %253, %252 : vector<8x128xf32>
    %255 = arith.divf %253, %254 : vector<8x128xf32>
    %256 = vector.extract_strided_slice %234 {offsets = [0, 256], sizes = [8, 128], strides = [1, 1]} : vector<8x384xf32> to vector<8x128xf32>
    %257 = arith.addf %239, %8 : vector<8x128xf32>
    %258 = arith.mulf %247, %257 : vector<8x128xf32>
    %259 = arith.addf %256, %258 : vector<8x128xf32>
    %260 = math.tanh %259 : vector<8x128xf32>
    %cst_78 = arith.constant 1.000000e+00 : f32
    %261 = vector.broadcast %cst_78 : f32 to vector<8x128xf32>
    %262 = arith.subf %261, %255 : vector<8x128xf32>
    %263 = arith.mulf %262, %260 : vector<8x128xf32>
    %264 = arith.mulf %255, %233 : vector<8x128xf32>
    %265 = arith.addf %263, %264 : vector<8x128xf32>
    %cst_79 = arith.constant 0.000000e+00 : f32
    %266 = vector.broadcast %cst_79 : f32 to vector<8x128xf32>
    %267 = arith.maximumf %265, %266 : vector<8x128xf32>
    %c0_80 = arith.constant 0 : index
    %c0_81 = arith.constant 0 : index
    %268 = vector.load %arg5[%c0_80, %c0_81] : memref<128x32xf32, #tpu.memory_space<vmem>>, vector<128x32xf32>
    %cst_82 = arith.constant dense<0.000000e+00> : vector<8x32xf32>
    %269 = tpu.matmul %267, %268, %cst_82 {dimension_numbers = #tpu.dot_dimension_numbers<[1], [0], [0], [1], [0, 0, 1, 1], [], []>} : vector<8x128xf32>, vector<128x32xf32>, vector<8x32xf32> -> vector<8x32xf32>
    %c0_83 = arith.constant 0 : index
    %c0_84 = arith.constant 0 : index
    %270 = vector.load %arg6[%c0_83, %c0_84] : memref<1x32xf32, #tpu.memory_space<vmem>>, vector<1x32xf32>
    %271 = vector.broadcast %270 : vector<1x32xf32> to vector<8x32xf32>
    %272 = arith.addf %269, %271 : vector<8x32xf32>
    %cst_85 = arith.constant 0.000000e+00 : f32
    %273 = vector.broadcast %cst_85 : f32 to vector<8x32xf32>
    %274 = arith.maximumf %272, %273 : vector<8x32xf32>
    %c0_86 = arith.constant 0 : index
    %c0_87 = arith.constant 0 : index
    %275 = vector.load %arg7[%c0_86, %c0_87] : memref<32x2xf32, #tpu.memory_space<vmem>>, vector<32x2xf32>
    %cst_88 = arith.constant dense<0.000000e+00> : vector<8x2xf32>
    %276 = tpu.matmul %274, %275, %cst_88 {dimension_numbers = #tpu.dot_dimension_numbers<[1], [0], [0], [1], [0, 0, 1, 1], [], []>} : vector<8x32xf32>, vector<32x2xf32>, vector<8x2xf32> -> vector<8x2xf32>
    %c0_89 = arith.constant 0 : index
    %c0_90 = arith.constant 0 : index
    %277 = vector.load %arg8[%c0_89, %c0_90] : memref<1x2xf32, #tpu.memory_space<vmem>>, vector<1x2xf32>
    %278 = vector.broadcast %277 : vector<1x2xf32> to vector<8x2xf32>
    %279 = arith.addf %276, %278 : vector<8x2xf32>
    %c0_91 = arith.constant 0 : index
    %c0_92 = arith.constant 0 : index
    %280 = vector.load %arg9[%c0_91, %c0_92] : memref<8x2xf32, #tpu.memory_space<vmem>>, vector<8x2xf32>
    tpu.vector_store %arg9[%c0_91, %c0_92], %279 {strides = array<i32>} : memref<8x2xf32, #tpu.memory_space<vmem>>, vector<8x2xf32>,
    return
  }
}

</mosaic_0001>

<bundles_post_ra>
// kernel: net_forward.1
= control target key start
LH: loop header
LB: loop body
LE: loop exit
PB: predicated region body
PF: predicated region fallthrough
CT: control target
= control target key end

     0   :  { %14 = vsyncpa [#allocation3], 0  ;;  %s2068_s30 = smov [#allocation2]   ;;  %s2839_s0 = inlined_call_operand.vmem [shape: f32[64,48], index: 0, kind: input, shape index: {}]   ;;  %s2840_s1 = inlined_call_operand.hbm [shape: f32[48,384], index: 1, kind: input, shape index: {}]   ;;  %s2841_s2 = inlined_call_operand.vmem [shape: f32[1,384], index: 2, kind: input, shape index: {}]   ;;  %s2842_s3 = inlined_call_operand.vmem [shape: bf16[128,384], index: 3, kind: input, shape index: {}]   ;;  %s2843_s4 = inlined_call_operand.vmem [shape: f32[1,128], index: 4, kind: input, shape index: {}]   ;;  %s2844_s5 = inlined_call_operand.vmem [shape: f32[128,32], index: 5, kind: input, shape index: {}]   ;;  %s2845_s6 = inlined_call_operand.vmem [shape: f32[1,32], index: 6, kind: input, shape index: {}]   ;;  %s2846_s7 = inlined_call_operand.vmem [shape: f32[32,2], index: 7, kind: input, shape index: {}]   ;;  %s2847_s8 = inlined_call_operand.vmem [shape: f32[1,2], index: 8, kind: input, shape index: {}]   ;;  %s2848_s9 = inlined_call_operand.vmem [shape: f32[8,2], index: 9, kind: output, shape index: {}]  }
   0x1   :  { %s22_s10 = sshll.u32 %s2068_s30, 4  ;;  %s23_s10 = int_to_ptr.vmem [resolvable:$true] %s22_s10 }
   0x2   :  { %s2054_s11 = scalar_lea.vmem %s23_s10, 2304  ;;  %p2059_p1 = scmp.lt.s32.totalorder %s23_s10, %s23_s10 }
   0x3   :  { %p2055_p0 = scmp.ne.s32.totalorder %s23_s10, %s2054_s11  ;;  %p2060_p2 = scmp.lt.s32.totalorder %s2054_s11, %s2054_s11 }
   0x5   :  { %p2061_p3 = por %p2060_p2, %p2059_p1 }
   0x7   :  { %p2062_p4 = pnand %p2061_p3, %p2055_p0 }
   0x9   :  { %2065 = shalt.err (!%p2062_p4)
}
   0xa   :  { %s2069_s12 = smov 384   ;;  %s2070_s13 = smov 24  }
   0xb   :  { %28 = dma.hbm_to_vmem [thread:$0]  %s2840_s1, 2304, %s23_s10, [#allocation3], %s2069_s12, %s2069_s12, %s2070_s13  }
   0xc   :  { %2066 = dma.done.wait [#allocation3], 2304  }
   0xd   :  { %2067 = vsyncadd [#allocation3], 4294964992  ;;  %v2851_v0 = vmov 0.0   ;;  %v71_v1 = vld [vmem:[#allocation2 + $0x80] sm:$0xff]  ;;  %v70_v2 = vld [vmem:[#allocation2 + $0x78] sm:$0xff]  ;;  %vm90_vm0 = vcmask 392192   ;;  %v75_v52 = vlaneseq }
   0xe   :  { %179 = vmatprep.mubr.f32.mxu0 %v2851_v0  ;;  %v68_v3 = vld [vmem:[#allocation2 + $0x68] sm:$0xff]  ;;  %135 = vmatprep.subr.mxu0 %v71_v1  ;;  %v67_v4 = vld [vmem:[#allocation2 + $0x60] sm:$0xff]  ;;  %v65_v5 = vld [vmem:[#allocation2 + $0x50] sm:$0xff]  ;;  %v2849_v48 = vmov 0   ;;  %vm2073_vm1 = vmmov 0   ;;  %vm1429_vm2 = vcmask 261120  }
   0xf   :  { %136 = vmatpush1.msra.mxu0 %v70_v2  ;;  %v64_v6 = vld [vmem:[#allocation2 + $0x48] sm:$0xff]  ;;  %v62_v7 = vld [vmem:[#allocation2 + $0x38] sm:$0xff]  ;;  %v47_v8 = vld [vmem:[%s2839_s0] sm:$0xff]  ;;  %v76_v53 = vshrl.u32 %v75_v52, 7  ;;  %vm1503_vm3 = vcmask 15360  }
  0x10   :  { %137 = vmatprep.subr.mxu0 %v68_v3  ;;  %v61_v9 = vld [vmem:[#allocation2 + $0x30] sm:$0xff]  ;;  %1690 = vmatprep.mubr.msk.f32.mxu1 %vm90_vm0, %v47_v8  ;;  %v59_v10 = vld [vmem:[#allocation2 + $0x20] sm:$0xff]  ;;  %v58_v11 = vld [vmem:[#allocation2 + $0x18] sm:$0xff] }
  0x11   :  { %138 = vmatpush1.msra.mxu0 %v67_v4  ;;  %v56_v12 = vld [vmem:[#allocation2 + $0x8] sm:$0xff]  ;;  %v55_v13 = vld [vmem:[#allocation2] sm:$0xff]  ;;  %v69_v18 = vld [vmem:[#allocation2 + $0x70] sm:$0xff]  ;;  %v77_v54 = vsub.s32 0, %v76_v53  ;;  %v81_v57 = vsub.s32 1, %v76_v53  ;;  %v85_v3 = vsub.s32 2, %v76_v53 }
  0x12   :  { %139 = vmatprep.subr.mxu0 %v65_v5  ;;  %v2135_v14 = vld [vmem:[%s2842_s3 + $0xac] ss:$12 sps:$4 sm:$0xff]   ;;  %v2140_v15 = vld [vmem:[%s2842_s3 + $0xa8] ss:$12 sps:$4 sm:$0xff]   ;;  %v2157_v20 = vld [vmem:[%s2842_s3 + $0x90] ss:$12 sps:$4 sm:$0xff]  }
  0x13   :  { %140 = vmatpush1.msra.mxu0 %v64_v6  ;;  %v72_v16 = vld [vmem:[#allocation2 + $0x88] sm:$0xff]  ;;  %v2145_v17 = vld [vmem:[%s2842_s3 + $0x94] ss:$12 sps:$4 sm:$0xff]   ;;  %v66_v21 = vld [vmem:[#allocation2 + $0x58] sm:$0xff] }
  0x14   :  { %141 = vmatprep.subr.mxu0 %v62_v7  ;;  %1678 = vmatprep.subr.mxu1 %v72_v16  ;;  %v48_v19 = vld [vmem:[%s2839_s0 + $0x8] sm:$0xff]  ;;  %v49_v23 = vld [vmem:[%s2839_s0 + $0x10] sm:$0xff]  ;;  %v63_v24 = vld [vmem:[#allocation2 + $0x40] sm:$0xff] }
  0x15   :  { %142 = vmatpush1.msra.mxu0 %v61_v9  ;;  %1679 = vmatpush3.msra.mxu1 %v72_v16  ;;  %v2163_v22 = vld [vmem:[%s2842_s3 + $0x7c] ss:$12 sps:$4 sm:$0xff]   ;;  %v2174_v25 = vld [vmem:[%s2842_s3 + $0x78] ss:$12 sps:$4 sm:$0xff]   ;;  %v2189_v29 = vld [vmem:[%s2842_s3 + $0x60] ss:$12 sps:$4 sm:$0xff]  }
  0x16   :  { %143 = vmatprep.subr.mxu0 %v59_v10  ;;  %1680 = vmatprep.subr.mxu1 %v69_v18  ;;  %v2180_v26 = vld [vmem:[%s2842_s3 + $0x64] ss:$12 sps:$4 sm:$0xff]   ;;  %v50_v27 = vld [vmem:[%s2839_s0 + $0x18] sm:$0xff]  ;;  %v60_v28 = vld [vmem:[#allocation2 + $0x28] sm:$0xff] }
  0x17   :  { %144 = vmatpush1.msra.mxu0 %v58_v11  ;;  %1681 = vmatpush3.msra.mxu1 %v69_v18  ;;  %v57_v30 = vld [vmem:[#allocation2 + $0x10] sm:$0xff]  ;;  %v2197_v31 = vld [vmem:[%s2842_s3 + $0x4c] ss:$12 sps:$4 sm:$0xff]   ;;  %v51_v32 = vld [vmem:[%s2839_s0 + $0x20] sm:$0xff] }
  0x18   :  { %145 = vmatprep.subr.mxu0 %v56_v12  ;;  %1682 = vmatprep.subr.mxu1 %v66_v21  ;;  %v2206_v33 = vld [vmem:[%s2842_s3 + $0xb0] ss:$12 sps:$4 sm:$0xff]   ;;  %v2213_v34 = vld [vmem:[%s2842_s3 + $0x48] ss:$12 sps:$4 sm:$0xff]   ;;  %v2228_v36 = vld [vmem:[%s2842_s3 + $0x98] ss:$12 sps:$4 sm:$0xff]  }
  0x19   :  { %146 = vmatpush1.msra.mxu0 %v55_v13  ;;  %1683 = vmatpush3.msra.mxu1 %v66_v21  ;;  %v2219_v35 = vld [vmem:[%s2842_s3 + $0x34] ss:$12 sps:$4 sm:$0xff]   ;;  %v52_v37 = vld [vmem:[%s2839_s0 + $0x28] sm:$0xff]  ;;  %v2238_v38 = vld [vmem:[%s2842_s3 + $0x30] ss:$12 sps:$4 sm:$0xff]  }
  0x1a   :  { %1510 = vmatmul.mubr.msk.f32.vlgmr.msra.gmra.mxu0 %vm90_vm0, %v47_v8  ;;  %436 = vmatprep.subr.bf16.mxu0 %v2135_v14  ;;  %v2244_v39 = vld [vmem:[%s2842_s3 + $0x1c] ss:$12 sps:$4 sm:$0xff]   ;;  %v2253_v40 = vld [vmem:[%s2842_s3 + $0x80] ss:$12 sps:$4 sm:$0xff]   ;;  %v53_v41 = vld [vmem:[%s2839_s0 + $0x30] sm:$0xff] }
  0x1b   :  { %437 = vmatpush1.bf16.msra.mxu0 %v2140_v15  ;;  %185 = vmatprep.mubr.f32.mxu0 %v2851_v0  ;;  %v2263_v42 = vld [vmem:[%s2842_s3 + $0x18] ss:$12 sps:$4 sm:$0xff]   ;;  %v2278_v44 = vld [vmem:[%s2842_s3 + $0x68] ss:$12 sps:$4 sm:$0xff]   ;;  %v2288_v46 = vld [vmem:[%s2842_s3] ss:$12 sps:$4 sm:$0xff]  }
  0x1c   :  { %438 = vmatprep.subr.bf16.mxu0 %v2145_v17  ;;  %1684 = vmatprep.subr.mxu1 %v63_v24  ;;  %v2269_v43 = vld [vmem:[%s2842_s3 + $0x4] ss:$12 sps:$4 sm:$0xff]   ;;  %v54_v45 = vld [vmem:[%s2839_s0 + $0x38] sm:$0xff]  ;;  %v2324_v50 = vld [vmem:[%s2842_s3 + $0x20] ss:$12 sps:$4 sm:$0xff]  }
  0x1d   :  { %1685 = vmatpush3.msra.mxu1 %v63_v24  ;;  %v2298_v47 = vld [vmem:[%s2842_s3 + $0x50] ss:$12 sps:$4 sm:$0xff]   ;;  %v2311_v49 = vld [vmem:[%s2842_s3 + $0x38] ss:$12 sps:$4 sm:$0xff]   ;;  %v2333_v51 = vld [vmem:[%s2842_s3 + $0x8] ss:$12 sps:$4 sm:$0xff]  }
  0x1e   :  { %1511 = vmatmul.mubr.msk.f32.gmra.mxu0 %vm90_vm0, %v48_v19  ;;  %1686 = vmatprep.subr.mxu1 %v60_v28  ;;  %v73_v55 = vld [vmem:[%s2841_s2] sm:$0x7] }
  0x1f   :  { %439 = vmatpush1.bf16.msra.mxu0 %v2157_v20  ;;  %191 = vmatprep.mubr.f32.mxu0 %v2851_v0  ;;  %v78_v59 = vrot.slane %v73_v55, %v77_v54  ;;  %v82_v61 = vrot.slane %v73_v55, %v81_v57  ;;  %v86_v8 = vrot.slane %v73_v55, %v85_v3 }
  0x20   :  { %440 = vmatprep.subr.bf16.mxu0 %v2163_v22  ;;  %1687 = vmatpush3.msra.mxu1 %v60_v28 }
  0x21   :  { %1688 = vmatprep.subr.mxu1 %v57_v30 }
  0x22   :  { %1512 = vmatmul.mubr.msk.f32.gmra.mxu0 %vm90_vm0, %v49_v23  ;;  %1689 = vmatpush3.msra.mxu1 %v57_v30 }
  0x23   :  { %441 = vmatpush1.bf16.msra.mxu0 %v2174_v25  ;;  %197 = vmatprep.mubr.f32.mxu0 %v2851_v0 }
  0x24   :  { %442 = vmatprep.subr.bf16.mxu0 %v2180_v26  ;;  %1702 = vmatprep.subr.bf16.mxu1 %v2851_v0 }
  0x25   :  { %1691 = vmatmul.mubr.msk.f32.vlgmr.msra.gmra.mxu1 %vm90_vm0, %v48_v19 }
  0x26   :  { %1513 = vmatmul.mubr.msk.f32.gmra.mxu0 %vm90_vm0, %v50_v27  ;;  %1703 = vmatpush3.bf16.msra.mxu1 %v2206_v33 }
  0x27   :  { %443 = vmatpush1.bf16.msra.mxu0 %v2189_v29  ;;  %203 = vmatprep.mubr.f32.mxu0 %v2851_v0 }
  0x28   :  { %444 = vmatprep.subr.bf16.mxu0 %v2197_v31  ;;  %1704 = vmatprep.subr.bf16.mxu1 %v2851_v0 }
  0x29   :  { %1693 = vmatprep.mubr.msk.f32.mxu1 %vm90_vm0, %v49_v23 }
  0x2a   :  { %1514 = vmatmul.mubr.msk.f32.gmra.mxu0 %vm90_vm0, %v51_v32  ;;  %1705 = vmatpush3.bf16.msra.mxu1 %v2228_v36 }
  0x2b   :  { %445 = vmatpush1.bf16.msra.mxu0 %v2213_v34  ;;  %209 = vmatprep.mubr.f32.mxu0 %v2851_v0 }
  0x2c   :  { %446 = vmatprep.subr.bf16.mxu0 %v2219_v35  ;;  %1706 = vmatprep.subr.bf16.mxu1 %v2851_v0 }
  0x2d   :  { %1694 = vmatmul.mubr.msk.f32.gmra.mxu1 %vm90_vm0, %v50_v27 }
  0x2e   :  { %1515 = vmatmul.mubr.msk.f32.gmra.mxu0 %vm90_vm0, %v52_v37  ;;  %1707 = vmatpush3.bf16.msra.mxu1 %v2253_v40 }
  0x2f   :  { %447 = vmatpush1.bf16.msra.mxu0 %v2238_v38  ;;  %215 = vmatprep.mubr.f32.mxu0 %v2851_v0 }
  0x30   :  { %448 = vmatprep.subr.bf16.mxu0 %v2244_v39  ;;  %1708 = vmatprep.subr.bf16.mxu1 %v2851_v0 }
  0x31   :  { %1696 = vmatprep.mubr.msk.f32.mxu1 %vm90_vm0, %v51_v32 }
  0x32   :  { %1516 = vmatmul.mubr.msk.f32.gmra.mxu0 %vm90_vm0, %v53_v41  ;;  %1709 = vmatpush3.bf16.msra.mxu1 %v2278_v44 }
  0x33   :  { %449 = vmatpush1.bf16.msra.mxu0 %v2263_v42  ;;  %221 = vmatprep.mubr.f32.mxu0 %v2851_v0 }
  0x34   :  { %450 = vmatprep.subr.bf16.mxu0 %v2269_v43  ;;  %1710 = vmatprep.subr.bf16.mxu1 %v2851_v0 }
  0x35   :  { %1697 = vmatmul.mubr.msk.f32.gmra.mxu1 %vm90_vm0, %v52_v37 }
  0x36   :  { %1517 = vmatmul.mubr.msk.f32.gmra.mxu0 %vm90_vm0, %v54_v45  ;;  %1699 = vmatprep.mubr.msk.f32.mxu1 %vm90_vm0, %v53_v41 }
  0x37   :  { %451 = vmatpush1.bf16.msra.mxu0 %v2288_v46  ;;  %468 = vmatprep.mubr.bf16.mxu0 %v2849_v48 }
  0x38   :  { %603 = vmatprep.subr.bf16.mxu0 %v2135_v14  ;;  %1711 = vmatpush3.bf16.msra.mxu1 %v2298_v47 }
  0x39   :  { %1712 = vmatprep.subr.bf16.mxu1 %v2851_v0  ;;  %1700 = vmatmul.mubr.msk.f32.gmra.mxu1 %vm90_vm0, %v54_v45 }
  0x3a   :  { %469 = vmatmul.mubr.bf16.vlgmr.msra.gmra.mxu0 %v2849_v48  ;;  %1718 = vmatprep.mubr.msk.bf16.mxu1 %vm2073_vm1, %v2851_v0 }
  0x3b   :  { %604 = vmatpush1.bf16.msra.mxu0 %v2140_v15  ;;  %635 = vmatprep.mubr.bf16.mxu0 %v2849_v48 }
  0x3c   :  { %605 = vmatprep.subr.bf16.mxu0 %v2145_v17  ;;  %1713 = vmatpush3.bf16.msra.mxu1 %v2311_v49 }
  0x3d   :  { %1714 = vmatprep.subr.bf16.mxu1 %v2851_v0 }
  0x3f   :  { %606 = vmatpush1.bf16.msra.mxu0 %v2157_v20 }
  0x40   :  { %607 = vmatprep.subr.bf16.mxu0 %v2163_v22  ;;  %1715 = vmatpush3.bf16.msra.mxu1 %v2324_v50 }
  0x41   :  { %1716 = vmatprep.subr.bf16.mxu1 %v2851_v0 }
  0x43   :  { %608 = vmatpush1.bf16.msra.mxu0 %v2174_v25 }
  0x44   :  { %609 = vmatprep.subr.bf16.mxu0 %v2180_v26  ;;  %1717 = vmatpush3.bf16.msra.mxu1 %v2333_v51 }
  0x45   :  { %1722 = vmatprep.subr.bf16.mxu1 %v2851_v0 }
  0x47   :  { %610 = vmatpush1.bf16.msra.mxu0 %v2189_v29  ;;  %1719 = vmatmul.mubr.bf16.vlgmr.msra.gmra.mxu1 %v2849_v48 }
  0x48   :  { %611 = vmatprep.subr.bf16.mxu0 %v2197_v31  ;;  %1723 = vmatpush3.bf16.msra.mxu1 %v2206_v33 }
  0x49   :  { %1738 = vmatprep.mubr.msk.bf16.mxu1 %vm2073_vm1, %v2851_v0  ;;  %1724 = vmatprep.subr.bf16.mxu1 %v2851_v0 }
  0x4b   :  { %612 = vmatpush1.bf16.msra.mxu0 %v2213_v34 }
  0x4c   :  { %613 = vmatprep.subr.bf16.mxu0 %v2219_v35  ;;  %1725 = vmatpush3.bf16.msra.mxu1 %v2228_v36 }
  0x4d   :  { %1726 = vmatprep.subr.bf16.mxu1 %v2851_v0 }
  0x4f   :  { %614 = vmatpush1.bf16.msra.mxu0 %v2238_v38 }
  0x50   :  { %615 = vmatprep.subr.bf16.mxu0 %v2244_v39  ;;  %1727 = vmatpush3.bf16.msra.mxu1 %v2253_v40 }
  0x51   :  { %1728 = vmatprep.subr.bf16.mxu1 %v2851_v0 }
  0x53   :  { %616 = vmatpush1.bf16.msra.mxu0 %v2263_v42 }
  0x54   :  { %617 = vmatprep.subr.bf16.mxu0 %v2269_v43  ;;  %1729 = vmatpush3.bf16.msra.mxu1 %v2278_v44 }
  0x55   :  { %1730 = vmatprep.subr.bf16.mxu1 %v2851_v0 }
  0x57   :  { %618 = vmatpush1.bf16.msra.mxu0 %v2288_v46 }
  0x58   :  { %706 = vmatprep.subr.bf16.mxu0 %v2135_v14  ;;  %1731 = vmatpush3.bf16.msra.mxu1 %v2298_v47 }
  0x59   :  { %1732 = vmatprep.subr.bf16.mxu1 %v2851_v0 }
  0x5c   :  { %1733 = vmatpush3.bf16.msra.mxu1 %v2311_v49 }
  0x5d   :  { %1734 = vmatprep.subr.bf16.mxu1 %v2851_v0 }
  0x60   :  { %1735 = vmatpush3.bf16.msra.mxu1 %v2324_v50 }
  0x61   :  { %1736 = vmatprep.subr.bf16.mxu1 %v2851_v0 }
  0x64   :  { %1737 = vmatpush3.bf16.msra.mxu1 %v2333_v51 }
  0x65   :  { %1742 = vmatprep.subr.bf16.mxu1 %v2851_v0 }
  0xda   :  { %v181_v56 = vpop.f32.mrf.mxu0 }
  0xdb   :  { %v182_v3 = vadd.f32 %v181_v56, %v78_v59 }
  0xdc   :  { %v183_v58 = vpop.f32.mrf.mxu0 }
  0xde   :  { %v187_v60 = vpop.f32.mrf.mxu0 }
  0xdf   :  { %v2372_v62 = vadd.f32 %v187_v60, %v78_v59 }
  0xe0   :  { %v189_v63 = vpop.f32.mrf.mxu0 }
  0xe1   :  { %v2374_v1 = vadd.f32 %v189_v63, %v82_v61 }
  0xe2   :  { %v193_v2 = vpop.f32.mrf.mxu0 }
  0xe3   :  { %v2376_v4 = vadd.f32 %v193_v2, %v78_v59 }
  0xe4   :  { %v195_v5 = vpop.f32.mrf.mxu0 }
  0xe5   :  { %v2378_v6 = vadd.f32 %v195_v5, %v82_v61  ;;  %v1692_v12 = vpop.f32.mrf.mxu1 }
  0xe6   :  { %v199_v7 = vpop.f32.mrf.mxu0  ;;  %v2384_v16 = vadd.f32 %v1692_v12, %v86_v8 }
  0xe7   :  { %v2380_v9 = vadd.f32 %v199_v7, %v78_v59  ;;  %v294_v27 = vpop.f32.mrf.mxu1 }
  0xe8   :  { %v201_v10 = vpop.f32.mrf.mxu0 }
  0xe9   :  { %v2382_v11 = vadd.f32 %v201_v10, %v82_v61 }
  0xea   :  { %v205_v13 = vpop.f32.mrf.mxu0 }
  0xeb   :  { %v2386_v18 = vadd.f32 %v205_v13, %v78_v59 }
  0xec   :  { %v207_v19 = vpop.f32.mrf.mxu0 }
  0xed   :  { %v2388_v21 = vadd.f32 %v207_v19, %v82_v61  ;;  %v1695_v32 = vpop.f32.mrf.mxu1 }
  0xee   :  { %v211_v23 = vpop.f32.mrf.mxu0  ;;  %v2394_v41 = vadd.f32 %v1695_v32, %v86_v8 }
  0xef   :  { %v2390_v24 = vadd.f32 %v211_v23, %v78_v59  ;;  %v304_v52 = vpop.f32.mrf.mxu1 }
  0xf0   :  { %v213_v28 = vpop.f32.mrf.mxu0  ;;  %v2398_v54 = vadd.f32 %v304_v52, %v86_v8 }
  0xf1   :  { %v2392_v30 = vadd.f32 %v213_v28, %v82_v61 }
  0xf2   :  { %v217_v37 = vpop.f32.mrf.mxu0 }
  0xf3   :  { %v2396_v45 = vadd.f32 %v217_v37, %v78_v59 }
  0xf4   :  { %v219_v53 = vpop.f32.mrf.mxu0 }
  0xf5   :  { %v2400_v55 = vadd.f32 %v219_v53, %v82_v61  ;;  %v1698_v2 = vpop.f32.mrf.mxu1 }
  0xf6   :  { %v223_v57 = vpop.f32.mrf.mxu0  ;;  %v2406_v7 = vadd.f32 %v1698_v2, %v86_v8 }
  0xf7   :  { %v2402_v60 = vadd.f32 %v223_v57, %v78_v59  ;;  %v314_v12 = vpop.f32.mrf.mxu1  ;;  %v184_v57 = vadd.f32 %v183_v58, %v82_v61 }
  0xf8   :  { %v225_v63 = vpop.f32.mrf.mxu0  ;;  %v2408_v19 = vadd.f32 %v314_v12, %v86_v8 }
  0xf9   :  { %v2404_v5 = vadd.f32 %v225_v63, %v82_v61  ;;  %v1701_v28 = vpop.f32.mrf.mxu1 }
  0xfa   :  { %v470_v10 = vpop.f32.mrf.mxu0  ;;  %v2410_v37 = vadd.f32 %v1701_v28, %v86_v8  ;;  %v2417_v28 = vld [vmem:[%s2843_s4] ss:$0 sm:$0xff] }
  0xfb   :  { %2853 = vst [vmem:[#allocation5_spill] sm:$0xff] %v2404_v5  ;;  %v493_v13 = vadd.f32 %v470_v10, %v182_v3  ;;  %v324_v53 = vpop.f32.mrf.mxu1 }
  0xfc   :  { %v472_v23 = vpop.f32.mrf.mxu0  ;;  %2854 = vst [vmem:[#allocation6_spill] sm:$0xff] %v2410_v37  ;;  %v2412_v48 = vadd.f32 %v324_v53, %v86_v8 }
  0xfd   :  { %v1543_v32 = vmul.f32 -1.442695, %v493_v13  ;;  %v500_v59 = vadd.f32 %v472_v23, %v184_v57  ;;  %v295_v23 = vadd.f32 %v294_v27, %v86_v8  ;;  %v2855_v8 = vmov 0.0  }
  0xfe   :  { %v474_v52 = vpop.f32.mrf.mxu0  ;;  %v2856_v27 = vmov 0  }
  0xff   :  { %1946 = vpow2.f32 %v1543_v32  ;;  %v1544_v63 = vmul.f32 -1.442695, %v500_v59 }
 0x100   :  { %v475_v56 = vpop.f32.mrf.mxu0 }
 0x101   :  { %1948 = vpow2.f32 %v1544_v63 }
 0x107   :  { %v589_v2 = vpop.f32.mrf.mxu1 }
 0x108   :  { %v590_v61 = vadd.f32 %v2417_v28, %v589_v2 }
 0x109   :  { %v1720_v0 = vpop.f32.mrf.mxu1 }
 0x10b   :  { %v592_v12 = vpop.f32.mrf.mxu1 }
 0x10c   :  { %v1947_v3 = vpop.eup %1946 }
 0x10d   :  { %v497_v10 = vadd.f32 1.0, %v1947_v3  ;;  %v1721_v5 = vpop.f32.mrf.mxu1 }
 0x10e   :  { %v1949_v13 = vpop.eup %1948 }
 0x10f   :  { %1950 = vrcp.f32 %v497_v10  ;;  %v504_v58 = vadd.f32 1.0, %v1949_v13 }
 0x111   :  { %1952 = vrcp.f32 %v504_v58 }
 0x11c   :  { %v1951_v32 = vpop.eup %1950 }
 0x11d   :  { %v595_v52 = vmul.f32 %v1951_v32, %v590_v61 }
 0x11e   :  { %v1953_v0 = vpop.eup %1952 }
 0x11f   :  { %v596_v53 = vadd.f32 %v595_v52, %v295_v23  ;;  %v598_v57 = vsub.f32 1.0, %v1953_v0  ;;  %v600_v5 = vmul.f32 0.0, %v1953_v0 }
 0x121   :  { %1954 = vtanh.f32 %v596_v53 }
 0x12e   :  { %v1955_v56 = vpop.eup %1954 }
 0x12f   :  { %v599_v59 = vmul.f32 %v1955_v56, %v598_v57 }
 0x131   :  { %v2420_v63 = vadd.f32 %v600_v5, %v599_v59 }
 0x133   :  { %v602_v3 = vpack.c.bf16 %v2420_v63, %v2420_v63 }
 0x135   :  { %636 = vmatmul.mubr.bf16.vlgmr.msra.gmra.mxu0 %v602_v3  ;;  %1739 = vmatmul.mubr.bf16.vlgmr.msra.gmra.mxu1 %v602_v3 }
 0x136   :  { %707 = vmatpush1.bf16.msra.mxu0 %v2140_v15  ;;  %1743 = vmatpush3.bf16.msra.mxu1 %v2206_v33 }
 0x137   :  { %708 = vmatprep.subr.bf16.mxu0 %v2145_v17  ;;  %1744 = vmatprep.subr.bf16.mxu1 %v2855_v8 }
 0x138   :  { %738 = vmatprep.mubr.bf16.mxu0 %v2856_v27  ;;  %1758 = vmatprep.mubr.msk.bf16.mxu1 %vm2073_vm1, %v2855_v8 }
 0x13a   :  { %709 = vmatpush1.bf16.msra.mxu0 %v2157_v20  ;;  %1745 = vmatpush3.bf16.msra.mxu1 %v2228_v36 }
 0x13b   :  { %710 = vmatprep.subr.bf16.mxu0 %v2163_v22  ;;  %1746 = vmatprep.subr.bf16.mxu1 %v2855_v8 }
 0x13e   :  { %711 = vmatpush1.bf16.msra.mxu0 %v2174_v25  ;;  %1747 = vmatpush3.bf16.msra.mxu1 %v2253_v40 }
 0x13f   :  { %712 = vmatprep.subr.bf16.mxu0 %v2180_v26  ;;  %1748 = vmatprep.subr.bf16.mxu1 %v2855_v8 }
 0x142   :  { %713 = vmatpush1.bf16.msra.mxu0 %v2189_v29  ;;  %1749 = vmatpush3.bf16.msra.mxu1 %v2278_v44 }
 0x143   :  { %714 = vmatprep.subr.bf16.mxu0 %v2197_v31  ;;  %1750 = vmatprep.subr.bf16.mxu1 %v2855_v8 }
 0x146   :  { %715 = vmatpush1.bf16.msra.mxu0 %v2213_v34  ;;  %1751 = vmatpush3.bf16.msra.mxu1 %v2298_v47 }
 0x147   :  { %716 = vmatprep.subr.bf16.mxu0 %v2219_v35  ;;  %1752 = vmatprep.subr.bf16.mxu1 %v2855_v8 }
 0x14a   :  { %717 = vmatpush1.bf16.msra.mxu0 %v2238_v38  ;;  %1753 = vmatpush3.bf16.msra.mxu1 %v2311_v49 }
 0x14b   :  { %718 = vmatprep.subr.bf16.mxu0 %v2244_v39  ;;  %1754 = vmatprep.subr.bf16.mxu1 %v2855_v8 }
 0x14e   :  { %719 = vmatpush1.bf16.msra.mxu0 %v2263_v42  ;;  %1755 = vmatpush3.bf16.msra.mxu1 %v2324_v50 }
 0x14f   :  { %720 = vmatprep.subr.bf16.mxu0 %v2269_v43  ;;  %1756 = vmatprep.subr.bf16.mxu1 %v2855_v8 }
 0x152   :  { %721 = vmatpush1.bf16.msra.mxu0 %v2288_v46  ;;  %1757 = vmatpush3.bf16.msra.mxu1 %v2333_v51 }
 0x153   :  { %809 = vmatprep.subr.bf16.mxu0 %v2135_v14  ;;  %1762 = vmatprep.subr.bf16.mxu1 %v2855_v8 }
 0x1f5   :  { %v637_v2 = vpop.f32.mrf.mxu0  ;;  %v692_v10 = vpop.f32.mrf.mxu1 }
 0x1f6   :  { %v644_v12 = vadd.f32 %v637_v2, %v2372_v62  ;;  %v693_v37 = vadd.f32 %v2417_v28, %v692_v10 }
 0x1f7   :  { %v639_v13 = vpop.f32.mrf.mxu0  ;;  %v1740_v58 = vpop.f32.mrf.mxu1 }
 0x1f8   :  { %v1553_v61 = vmul.f32 -1.442695, %v644_v12  ;;  %v651_v0 = vadd.f32 %v639_v13, %v2374_v1 }
 0x1f9   :  { %v641_v32 = vpop.f32.mrf.mxu0  ;;  %v695_v23 = vpop.f32.mrf.mxu1 }
 0x1fa   :  { %1956 = vpow2.f32 %v1553_v61  ;;  %v1554_v57 = vmul.f32 -1.442695, %v651_v0 }
 0x1fb   :  { %v642_v52 = vpop.f32.mrf.mxu0  ;;  %v1741_v53 = vpop.f32.mrf.mxu1 }
 0x1fc   :  { %1958 = vpow2.f32 %v1554_v57 }
 0x207   :  { %v1957_v56 = vpop.eup %1956 }
 0x208   :  { %v648_v59 = vadd.f32 1.0, %v1957_v56 }
 0x209   :  { %v1959_v5 = vpop.eup %1958 }
 0x20a   :  { %1960 = vrcp.f32 %v648_v59  ;;  %v655_v3 = vadd.f32 1.0, %v1959_v5 }
 0x20c   :  { %1962 = vrcp.f32 %v655_v3 }
 0x217   :  { %v1961_v62 = vpop.eup %1960 }
 0x218   :  { %v698_v2 = vmul.f32 %v1961_v62, %v693_v37 }
 0x219   :  { %v1963_v58 = vpop.eup %1962 }
 0x21a   :  { %v699_v12 = vadd.f32 %v698_v2, %v2384_v16  ;;  %v701_v61 = vsub.f32 1.0, %v1963_v58  ;;  %v703_v1 = vmul.f32 %v1963_v58, %v2420_v63 }
 0x21c   :  { %1964 = vtanh.f32 %v699_v12 }
 0x229   :  { %v1965_v32 = vpop.eup %1964 }
 0x22a   :  { %v702_v23 = vmul.f32 %v1965_v32, %v701_v61 }
 0x22c   :  { %v2464_v13 = vadd.f32 %v703_v1, %v702_v23 }
 0x22e   :  { %v705_v52 = vpack.c.bf16 %v2464_v13, %v2464_v13 }
 0x230   :  { %739 = vmatmul.mubr.bf16.vlgmr.msra.gmra.mxu0 %v705_v52  ;;  %1759 = vmatmul.mubr.bf16.vlgmr.msra.gmra.mxu1 %v705_v52 }
 0x231   :  { %810 = vmatpush1.bf16.msra.mxu0 %v2140_v15  ;;  %1763 = vmatpush3.bf16.msra.mxu1 %v2206_v33 }
 0x232   :  { %811 = vmatprep.subr.bf16.mxu0 %v2145_v17  ;;  %1764 = vmatprep.subr.bf16.mxu1 %v2855_v8 }
 0x233   :  { %841 = vmatprep.mubr.bf16.mxu0 %v2856_v27  ;;  %1778 = vmatprep.mubr.msk.bf16.mxu1 %vm2073_vm1, %v2855_v8 }
 0x235   :  { %812 = vmatpush1.bf16.msra.mxu0 %v2157_v20  ;;  %1765 = vmatpush3.bf16.msra.mxu1 %v2228_v36 }
 0x236   :  { %813 = vmatprep.subr.bf16.mxu0 %v2163_v22  ;;  %1766 = vmatprep.subr.bf16.mxu1 %v2855_v8 }
 0x239   :  { %814 = vmatpush1.bf16.msra.mxu0 %v2174_v25  ;;  %1767 = vmatpush3.bf16.msra.mxu1 %v2253_v40 }
 0x23a   :  { %815 = vmatprep.subr.bf16.mxu0 %v2180_v26  ;;  %1768 = vmatprep.subr.bf16.mxu1 %v2855_v8 }
 0x23d   :  { %816 = vmatpush1.bf16.msra.mxu0 %v2189_v29  ;;  %1769 = vmatpush3.bf16.msra.mxu1 %v2278_v44 }
 0x23e   :  { %817 = vmatprep.subr.bf16.mxu0 %v2197_v31  ;;  %1770 = vmatprep.subr.bf16.mxu1 %v2855_v8 }
 0x241   :  { %818 = vmatpush1.bf16.msra.mxu0 %v2213_v34  ;;  %1771 = vmatpush3.bf16.msra.mxu1 %v2298_v47 }
 0x242   :  { %819 = vmatprep.subr.bf16.mxu0 %v2219_v35  ;;  %1772 = vmatprep.subr.bf16.mxu1 %v2855_v8 }
 0x245   :  { %820 = vmatpush1.bf16.msra.mxu0 %v2238_v38  ;;  %1773 = vmatpush3.bf16.msra.mxu1 %v2311_v49 }
 0x246   :  { %821 = vmatprep.subr.bf16.mxu0 %v2244_v39  ;;  %1774 = vmatprep.subr.bf16.mxu1 %v2855_v8 }
 0x249   :  { %822 = vmatpush1.bf16.msra.mxu0 %v2263_v42  ;;  %1775 = vmatpush3.bf16.msra.mxu1 %v2324_v50 }
 0x24a   :  { %823 = vmatprep.subr.bf16.mxu0 %v2269_v43  ;;  %1776 = vmatprep.subr.bf16.mxu1 %v2855_v8 }
 0x24d   :  { %824 = vmatpush1.bf16.msra.mxu0 %v2288_v46  ;;  %1777 = vmatpush3.bf16.msra.mxu1 %v2333_v51 }
 0x24e   :  { %912 = vmatprep.subr.bf16.mxu0 %v2135_v14  ;;  %1782 = vmatprep.subr.bf16.mxu1 %v2855_v8 }
 0x2f0   :  { %v740_v16 = vpop.f32.mrf.mxu0  ;;  %v795_v37 = vpop.f32.mrf.mxu1 }
 0x2f1   :  { %v747_v63 = vadd.f32 %v740_v16, %v2376_v4  ;;  %v796_v32 = vadd.f32 %v2417_v28, %v795_v37 }
 0x2f2   :  { %v742_v10 = vpop.f32.mrf.mxu0  ;;  %v1760_v53 = vpop.f32.mrf.mxu1 }
 0x2f3   :  { %v1555_v0 = vmul.f32 -1.442695, %v747_v63  ;;  %v754_v3 = vadd.f32 %v742_v10, %v2378_v6 }
 0x2f4   :  { %v744_v57 = vpop.f32.mrf.mxu0  ;;  %v798_v56 = vpop.f32.mrf.mxu1 }
 0x2f5   :  { %1966 = vpow2.f32 %v1555_v0  ;;  %v1556_v62 = vmul.f32 -1.442695, %v754_v3 }
 0x2f6   :  { %v745_v59 = vpop.f32.mrf.mxu0  ;;  %v1761_v5 = vpop.f32.mrf.mxu1 }
 0x2f7   :  { %1968 = vpow2.f32 %v1556_v62 }
 0x302   :  { %v1967_v2 = vpop.eup %1966 }
 0x303   :  { %v751_v12 = vadd.f32 1.0, %v1967_v2 }
 0x304   :  { %v1969_v58 = vpop.eup %1968 }
 0x305   :  { %1970 = vrcp.f32 %v751_v12  ;;  %v758_v61 = vadd.f32 1.0, %v1969_v58 }
 0x307   :  { %1972 = vrcp.f32 %v758_v61 }
 0x312   :  { %v1971_v4 = vpop.eup %1970 }
 0x313   :  { %v801_v23 = vmul.f32 %v1971_v4, %v796_v32 }
 0x314   :  { %v1973_v52 = vpop.eup %1972 }
 0x315   :  { %v802_v1 = vadd.f32 %v801_v23, %v2398_v54  ;;  %v804_v16 = vsub.f32 1.0, %v1973_v52  ;;  %v806_v6 = vmul.f32 %v1973_v52, %v2464_v13 }
 0x317   :  { %1974 = vtanh.f32 %v802_v1 }
 0x324   :  { %v1975_v63 = vpop.eup %1974 }
 0x325   :  { %v805_v53 = vmul.f32 %v1975_v63, %v804_v16 }
 0x327   :  { %v2508_v10 = vadd.f32 %v806_v6, %v805_v53 }
 0x329   :  { %v808_v0 = vpack.c.bf16 %v2508_v10, %v2508_v10 }
 0x32b   :  { %842 = vmatmul.mubr.bf16.vlgmr.msra.gmra.mxu0 %v808_v0  ;;  %1779 = vmatmul.mubr.bf16.vlgmr.msra.gmra.mxu1 %v808_v0 }
 0x32c   :  { %913 = vmatpush1.bf16.msra.mxu0 %v2140_v15  ;;  %1783 = vmatpush3.bf16.msra.mxu1 %v2206_v33 }
 0x32d   :  { %914 = vmatprep.subr.bf16.mxu0 %v2145_v17  ;;  %1784 = vmatprep.subr.bf16.mxu1 %v2855_v8 }
 0x32e   :  { %944 = vmatprep.mubr.bf16.mxu0 %v2856_v27  ;;  %1798 = vmatprep.mubr.msk.bf16.mxu1 %vm2073_vm1, %v2855_v8 }
 0x330   :  { %915 = vmatpush1.bf16.msra.mxu0 %v2157_v20  ;;  %1785 = vmatpush3.bf16.msra.mxu1 %v2228_v36 }
 0x331   :  { %916 = vmatprep.subr.bf16.mxu0 %v2163_v22  ;;  %1786 = vmatprep.subr.bf16.mxu1 %v2855_v8 }
 0x334   :  { %917 = vmatpush1.bf16.msra.mxu0 %v2174_v25  ;;  %1787 = vmatpush3.bf16.msra.mxu1 %v2253_v40 }
 0x335   :  { %918 = vmatprep.subr.bf16.mxu0 %v2180_v26  ;;  %1788 = vmatprep.subr.bf16.mxu1 %v2855_v8 }
 0x338   :  { %919 = vmatpush1.bf16.msra.mxu0 %v2189_v29  ;;  %1789 = vmatpush3.bf16.msra.mxu1 %v2278_v44 }
 0x339   :  { %920 = vmatprep.subr.bf16.mxu0 %v2197_v31  ;;  %1790 = vmatprep.subr.bf16.mxu1 %v2855_v8 }
 0x33c   :  { %921 = vmatpush1.bf16.msra.mxu0 %v2213_v34  ;;  %1791 = vmatpush3.bf16.msra.mxu1 %v2298_v47 }
 0x33d   :  { %922 = vmatprep.subr.bf16.mxu0 %v2219_v35  ;;  %1792 = vmatprep.subr.bf16.mxu1 %v2855_v8 }
 0x340   :  { %923 = vmatpush1.bf16.msra.mxu0 %v2238_v38  ;;  %1793 = vmatpush3.bf16.msra.mxu1 %v2311_v49 }
 0x341   :  { %924 = vmatprep.subr.bf16.mxu0 %v2244_v39  ;;  %1794 = vmatprep.subr.bf16.mxu1 %v2855_v8 }
 0x344   :  { %925 = vmatpush1.bf16.msra.mxu0 %v2263_v42  ;;  %1795 = vmatpush3.bf16.msra.mxu1 %v2324_v50 }
 0x345   :  { %926 = vmatprep.subr.bf16.mxu0 %v2269_v43  ;;  %1796 = vmatprep.subr.bf16.mxu1 %v2855_v8 }
 0x348   :  { %927 = vmatpush1.bf16.msra.mxu0 %v2288_v46  ;;  %1797 = vmatpush3.bf16.msra.mxu1 %v2333_v51 }
 0x349   :  { %1015 = vmatprep.subr.bf16.mxu0 %v2135_v14  ;;  %1802 = vmatprep.subr.bf16.mxu1 %v2855_v8 }
 0x3eb   :  { %v843_v54 = vpop.f32.mrf.mxu0  ;;  %v898_v13 = vpop.f32.mrf.mxu1 }
 0x3ec   :  { %v850_v37 = vadd.f32 %v843_v54, %v2380_v9  ;;  %v899_v1 = vadd.f32 %v2417_v28, %v898_v13 }
 0x3ed   :  { %v845_v57 = vpop.f32.mrf.mxu0  ;;  %v1780_v56 = vpop.f32.mrf.mxu1 }
 0x3ee   :  { %v1557_v59 = vmul.f32 -1.442695, %v850_v37  ;;  %v857_v12 = vadd.f32 %v845_v57, %v2382_v11 }
 0x3ef   :  { %v847_v5 = vpop.f32.mrf.mxu0  ;;  %v901_v3 = vpop.f32.mrf.mxu1 }
 0x3f0   :  { %1976 = vpow2.f32 %v1557_v59  ;;  %v1558_v58 = vmul.f32 -1.442695, %v857_v12 }
 0x3f1   :  { %v848_v62 = vpop.f32.mrf.mxu0  ;;  %v1781_v2 = vpop.f32.mrf.mxu1 }
 0x3f2   :  { %1978 = vpow2.f32 %v1558_v58 }
 0x3fd   :  { %v1977_v61 = vpop.eup %1976 }
 0x3fe   :  { %v854_v32 = vadd.f32 1.0, %v1977_v61 }
 0x3ff   :  { %v1979_v4 = vpop.eup %1978 }
 0x400   :  { %1980 = vrcp.f32 %v854_v32  ;;  %v861_v23 = vadd.f32 1.0, %v1979_v4 }
 0x402   :  { %1982 = vrcp.f32 %v861_v23 }
 0x40d   :  { %v1981_v9 = vpop.eup %1980 }
 0x40e   :  { %v904_v52 = vmul.f32 %v1981_v9, %v899_v1 }
 0x40f   :  { %v1983_v63 = vpop.eup %1982 }
 0x410   :  { %v905_v16 = vadd.f32 %v904_v52, %v2394_v41  ;;  %v907_v53 = vsub.f32 1.0, %v1983_v63  ;;  %v909_v11 = vmul.f32 %v1983_v63, %v2508_v10  ;;  %v2620_v63 = vld [vmem:[%s2842_s3 + $0x90] ss:$12 sps:$4 sm:$0xff]  }
 0x412   :  { %1984 = vtanh.f32 %v905_v16  ;;  %v2603_v16 = vld [vmem:[%s2842_s3 + $0xa8] ss:$12 sps:$4 sm:$0xff]  }
 0x41f   :  { %v1985_v6 = vpop.eup %1984 }
 0x420   :  { %v908_v0 = vmul.f32 %v1985_v6, %v907_v53  ;;  %v2634_v53 = vld [vmem:[%s2842_s3 + $0x78] ss:$12 sps:$4 sm:$0xff]  }
 0x422   :  { %v2552_v54 = vadd.f32 %v909_v11, %v908_v0 }
 0x424   :  { %v911_v37 = vpack.c.bf16 %v2552_v54, %v2552_v54 }
 0x426   :  { %945 = vmatmul.mubr.bf16.vlgmr.msra.gmra.mxu0 %v911_v37  ;;  %1799 = vmatmul.mubr.bf16.vlgmr.msra.gmra.mxu1 %v911_v37 }
 0x427   :  { %1016 = vmatpush1.bf16.msra.mxu0 %v2140_v15  ;;  %1803 = vmatpush3.bf16.msra.mxu1 %v2206_v33 }
 0x428   :  { %1017 = vmatprep.subr.bf16.mxu0 %v2145_v17  ;;  %1804 = vmatprep.subr.bf16.mxu1 %v2855_v8 }
 0x429   :  { %1047 = vmatprep.mubr.bf16.mxu0 %v2856_v27  ;;  %1818 = vmatprep.mubr.msk.bf16.mxu1 %vm2073_vm1, %v2855_v8 }
 0x42b   :  { %1018 = vmatpush1.bf16.msra.mxu0 %v2157_v20  ;;  %1805 = vmatpush3.bf16.msra.mxu1 %v2228_v36 }
 0x42c   :  { %1019 = vmatprep.subr.bf16.mxu0 %v2163_v22  ;;  %1806 = vmatprep.subr.bf16.mxu1 %v2855_v8 }
 0x42f   :  { %1020 = vmatpush1.bf16.msra.mxu0 %v2174_v25  ;;  %1807 = vmatpush3.bf16.msra.mxu1 %v2253_v40 }
 0x430   :  { %1021 = vmatprep.subr.bf16.mxu0 %v2180_v26  ;;  %1808 = vmatprep.subr.bf16.mxu1 %v2855_v8 }
 0x433   :  { %1022 = vmatpush1.bf16.msra.mxu0 %v2189_v29  ;;  %1809 = vmatpush3.bf16.msra.mxu1 %v2278_v44 }
 0x434   :  { %1023 = vmatprep.subr.bf16.mxu0 %v2197_v31  ;;  %1810 = vmatprep.subr.bf16.mxu1 %v2855_v8 }
 0x437   :  { %1024 = vmatpush1.bf16.msra.mxu0 %v2213_v34  ;;  %1811 = vmatpush3.bf16.msra.mxu1 %v2298_v47 }
 0x438   :  { %1025 = vmatprep.subr.bf16.mxu0 %v2219_v35  ;;  %1812 = vmatprep.subr.bf16.mxu1 %v2855_v8 }
 0x43b   :  { %1026 = vmatpush1.bf16.msra.mxu0 %v2238_v38  ;;  %1813 = vmatpush3.bf16.msra.mxu1 %v2311_v49 }
 0x43c   :  { %1027 = vmatprep.subr.bf16.mxu0 %v2244_v39  ;;  %1814 = vmatprep.subr.bf16.mxu1 %v2855_v8 }
 0x43f   :  { %1028 = vmatpush1.bf16.msra.mxu0 %v2263_v42  ;;  %1815 = vmatpush3.bf16.msra.mxu1 %v2324_v50 }
 0x440   :  { %1029 = vmatprep.subr.bf16.mxu0 %v2269_v43  ;;  %1816 = vmatprep.subr.bf16.mxu1 %v2855_v8 }
 0x443   :  { %1030 = vmatpush1.bf16.msra.mxu0 %v2288_v46  ;;  %1817 = vmatpush3.bf16.msra.mxu1 %v2333_v51 }
 0x444   :  { %1118 = vmatprep.subr.bf16.mxu0 %v2135_v14  ;;  %1822 = vmatprep.subr.bf16.mxu1 %v2855_v8 }
 0x4e6   :  { %v946_v15 = vpop.f32.mrf.mxu0  ;;  %v1001_v17 = vpop.f32.mrf.mxu1 }
 0x4e7   :  { %v953_v20 = vadd.f32 %v946_v15, %v2386_v18  ;;  %v1002_v12 = vadd.f32 %v2417_v28, %v1001_v17 }
 0x4e8   :  { %v948_v22 = vpop.f32.mrf.mxu0  ;;  %v1800_v25 = vpop.f32.mrf.mxu1 }
 0x4e9   :  { %v1559_v41 = vmul.f32 -1.442695, %v953_v20  ;;  %v960_v59 = vadd.f32 %v948_v22, %v2388_v21 }
 0x4ea   :  { %v950_v10 = vpop.f32.mrf.mxu0  ;;  %v1004_v13 = vpop.f32.mrf.mxu1 }
 0x4eb   :  { %1986 = vpow2.f32 %v1559_v41  ;;  %v1560_v5 = vmul.f32 -1.442695, %v960_v59  ;;  %v2036_v59 = vld [vmem:[%s2842_s3 + $0x60] ss:$12 sps:$4 sm:$0xff]  }
 0x4ec   :  { %v951_v57 = vpop.f32.mrf.mxu0  ;;  %v1801_v56 = vpop.f32.mrf.mxu1 }
 0x4ed   :  { %1988 = vpow2.f32 %v1560_v5  ;;  %v2033_v57 = vld [vmem:[%s2842_s3 + $0x98] ss:$12 sps:$4 sm:$0xff]   ;;  %v2037_v5 = vld [vmem:[%s2842_s3 + $0x68] ss:$12 sps:$4 sm:$0xff]  }
 0x4ee   :  { %v2035_v56 = vld [vmem:[%s2842_s3 + $0x64] ss:$12 sps:$4 sm:$0xff]  }
 0x4f8   :  { %v1987_v3 = vpop.eup %1986 }
 0x4f9   :  { %v957_v14 = vadd.f32 1.0, %v1987_v3  ;;  %v2038_v3 = vld [vmem:[%s2842_s3 + $0x4c] ss:$12 sps:$4 sm:$0xff]  }
 0x4fa   :  { %v1989_v62 = vpop.eup %1988 }
 0x4fb   :  { %1990 = vrcp.f32 %v957_v14  ;;  %v964_v2 = vadd.f32 1.0, %v1989_v62  ;;  %v2039_v14 = vld [vmem:[%s2842_s3 + $0x48] ss:$12 sps:$4 sm:$0xff]  }
 0x4fc   :  { %v2040_v62 = vld [vmem:[%s2842_s3 + $0x34] ss:$12 sps:$4 sm:$0xff]  }
 0x4fd   :  { %1992 = vrcp.f32 %v964_v2  ;;  %v2041_v2 = vld [vmem:[%s2842_s3 + $0x30] ss:$12 sps:$4 sm:$0xff]  }
 0x508   :  { %v1991_v18 = vpop.eup %1990 }
 0x509   :  { %v1007_v58 = vmul.f32 %v1991_v18, %v1002_v12  ;;  %v2042_v12 = vld [vmem:[%s2842_s3 + $0x1c] ss:$12 sps:$4 sm:$0xff]   ;;  %v2044_v18 = vld [vmem:[%s2842_s3 + $0x4] ss:$12 sps:$4 sm:$0xff]  }
 0x50a   :  { %v1993_v32 = vpop.eup %1992 }
 0x50b   :  { %v1008_v61 = vadd.f32 %v1007_v58, %v2408_v19  ;;  %v1010_v4 = vsub.f32 1.0, %v1993_v32  ;;  %v1012_v21 = vmul.f32 %v1993_v32, %v2552_v54  ;;  %v2610_v19 = vld [vmem:[%s2842_s3 + $0x94] ss:$12 sps:$4 sm:$0xff]  }
 0x50d   :  { %1994 = vtanh.f32 %v1008_v61 }
 0x51a   :  { %v1995_v23 = vpop.eup %1994 }
 0x51b   :  { %v1011_v1 = vmul.f32 %v1995_v23, %v1010_v4 }
 0x51d   :  { %v2596_v9 = vadd.f32 %v1012_v21, %v1011_v1 }
 0x51f   :  { %v1014_v52 = vpack.c.bf16 %v2596_v9, %v2596_v9 }
 0x521   :  { %1048 = vmatmul.mubr.bf16.vlgmr.msra.gmra.mxu0 %v1014_v52  ;;  %1819 = vmatmul.mubr.bf16.vlgmr.msra.gmra.mxu1 %v1014_v52 }
 0x522   :  { %1119 = vmatpush1.bf16.msra.mxu0 %v2603_v16  ;;  %1823 = vmatpush3.bf16.msra.mxu1 %v2206_v33  ;;  %v2627_v33 = vld [vmem:[%s2842_s3 + $0x7c] ss:$12 sps:$4 sm:$0xff]  }
 0x523   :  { %1120 = vmatprep.subr.bf16.mxu0 %v2610_v19  ;;  %1824 = vmatprep.subr.bf16.mxu1 %v2855_v8 }
 0x524   :  { %1150 = vmatprep.mubr.bf16.mxu0 %v2856_v27  ;;  %1838 = vmatprep.mubr.msk.bf16.mxu1 %vm2073_vm1, %v2855_v8 }
 0x526   :  { %1121 = vmatpush1.bf16.msra.mxu0 %v2620_v63  ;;  %1825 = vmatpush3.bf16.msra.mxu1 %v2228_v36 }
 0x527   :  { %1122 = vmatprep.subr.bf16.mxu0 %v2627_v33  ;;  %1826 = vmatprep.subr.bf16.mxu1 %v2855_v8 }
 0x52a   :  { %1123 = vmatpush1.bf16.msra.mxu0 %v2634_v53  ;;  %1827 = vmatpush3.bf16.msra.mxu1 %v2253_v40 }
 0x52b   :  { %1124 = vmatprep.subr.bf16.mxu0 %v2180_v26  ;;  %1828 = vmatprep.subr.bf16.mxu1 %v2855_v8  ;;  %v2031_v26 = vld [vmem:[%s2842_s3 + $0xac] ss:$12 sps:$4 sm:$0xff]  }
 0x52e   :  { %1125 = vmatpush1.bf16.msra.mxu0 %v2189_v29  ;;  %1829 = vmatpush3.bf16.msra.mxu1 %v2278_v44 }
 0x52f   :  { %1126 = vmatprep.subr.bf16.mxu0 %v2197_v31  ;;  %1830 = vmatprep.subr.bf16.mxu1 %v2855_v8 }
 0x532   :  { %1127 = vmatpush1.bf16.msra.mxu0 %v2213_v34  ;;  %1831 = vmatpush3.bf16.msra.mxu1 %v2298_v47 }
 0x533   :  { %1128 = vmatprep.subr.bf16.mxu0 %v2219_v35  ;;  %1832 = vmatprep.subr.bf16.mxu1 %v2855_v8 }
 0x536   :  { %1129 = vmatpush1.bf16.msra.mxu0 %v2238_v38  ;;  %1833 = vmatpush3.bf16.msra.mxu1 %v2311_v49 }
 0x537   :  { %1130 = vmatprep.subr.bf16.mxu0 %v2244_v39  ;;  %1834 = vmatprep.subr.bf16.mxu1 %v2855_v8 }
 0x53a   :  { %1131 = vmatpush1.bf16.msra.mxu0 %v2263_v42  ;;  %1835 = vmatpush3.bf16.msra.mxu1 %v2324_v50 }
 0x53b   :  { %1132 = vmatprep.subr.bf16.mxu0 %v2269_v43  ;;  %1836 = vmatprep.subr.bf16.mxu1 %v2855_v8 }
 0x53e   :  { %1133 = vmatpush1.bf16.msra.mxu0 %v2288_v46  ;;  %1837 = vmatpush3.bf16.msra.mxu1 %v2333_v51 }
 0x53f   :  { %1221 = vmatprep.subr.bf16.mxu0 %v2031_v26  ;;  %1842 = vmatprep.subr.bf16.mxu1 %v2855_v8 }
 0x5e1   :  { %v1049_v29 = vpop.f32.mrf.mxu0  ;;  %v1104_v31 = vpop.f32.mrf.mxu1 }
 0x5e2   :  { %v1056_v34 = vadd.f32 %v1049_v29, %v2390_v24  ;;  %v1105_v37 = vadd.f32 %v2417_v28, %v1104_v31 }
 0x5e3   :  { %v1051_v35 = vpop.f32.mrf.mxu0  ;;  %v1820_v36 = vpop.f32.mrf.mxu1 }
 0x5e4   :  { %v1561_v38 = vmul.f32 -1.442695, %v1056_v34  ;;  %v1063_v44 = vadd.f32 %v1051_v35, %v2392_v30 }
 0x5e5   :  { %v1053_v39 = vpop.f32.mrf.mxu0  ;;  %v1107_v40 = vpop.f32.mrf.mxu1 }
 0x5e6   :  { %1996 = vpow2.f32 %v1561_v38  ;;  %v1562_v46 = vmul.f32 -1.442695, %v1063_v44  ;;  %v1336_v44 = vld [vmem:[%s2844_s5 + $0x60] sm:$0xff] }
 0x5e7   :  { %v1054_v42 = vpop.f32.mrf.mxu0  ;;  %v1821_v43 = vpop.f32.mrf.mxu1 }
 0x5e8   :  { %1998 = vpow2.f32 %v1562_v46  ;;  %v1338_v42 = vld [vmem:[%s2844_s5 + $0x70] sm:$0xff]  ;;  %v1337_v43 = vld [vmem:[%s2844_s5 + $0x68] sm:$0xff]  ;;  %v1335_v46 = vld [vmem:[%s2844_s5 + $0x58] sm:$0xff] }
 0x5f3   :  { %v1997_v6 = vpop.eup %1996 }
 0x5f4   :  { %v1060_v0 = vadd.f32 1.0, %v1997_v6  ;;  %v1334_v6 = vld [vmem:[%s2844_s5 + $0x50] sm:$0xff] }
 0x5f5   :  { %v1999_v11 = vpop.eup %1998 }
 0x5f6   :  { %2000 = vrcp.f32 %v1060_v0  ;;  %v1067_v54 = vadd.f32 1.0, %v1999_v11  ;;  %v1333_v0 = vld [vmem:[%s2844_s5 + $0x48] sm:$0xff]  ;;  %v1332_v11 = vld [vmem:[%s2844_s5 + $0x40] sm:$0xff] }
 0x5f8   :  { %2002 = vrcp.f32 %v1067_v54  ;;  %v1331_v54 = vld [vmem:[%s2844_s5 + $0x38] sm:$0xff] }
 0x603   :  { %v2001_v24 = vpop.eup %2000 }
 0x604   :  { %v1110_v15 = vmul.f32 %v2001_v24, %v1105_v37  ;;  %v1330_v37 = vld [vmem:[%s2844_s5 + $0x30] sm:$0xff]  ;;  %v1329_v24 = vld [vmem:[%s2844_s5 + $0x28] sm:$0xff] }
 0x605   :  { %v2003_v20 = vpop.eup %2002 }
 0x606   :  { %v1111_v17 = vadd.f32 %v1110_v15, %v2406_v7  ;;  %v1113_v22 = vsub.f32 1.0, %v2003_v20  ;;  %v1115_v30 = vmul.f32 %v2003_v20, %v2596_v9  ;;  %v2032_v7 = vld [vmem:[%s2842_s3 + $0xb0] ss:$12 sps:$4 sm:$0xff]   ;;  %v1328_v15 = vld [vmem:[%s2844_s5 + $0x20] sm:$0xff] }
 0x607   :  { %v1326_v20 = vld [vmem:[%s2844_s5 + $0x10] sm:$0xff] }
 0x608   :  { %2004 = vtanh.f32 %v1111_v17  ;;  %v1327_v17 = vld [vmem:[%s2844_s5 + $0x18] sm:$0xff] }
 0x615   :  { %v2005_v25 = vpop.eup %2004 }
 0x616   :  { %v1114_v41 = vmul.f32 %v2005_v25, %v1113_v22  ;;  %v1325_v22 = vld [vmem:[%s2844_s5 + $0x8] sm:$0xff]  ;;  %v1324_v25 = vld [vmem:[%s2844_s5] sm:$0xff] }
 0x618   :  { %v2667_v10 = vadd.f32 %v1115_v30, %v1114_v41  ;;  %v1421_v41 = vld [vmem:[%s2846_s7 + $0x18] sm:$0xff] }
 0x61a   :  { %v1117_v13 = vpack.c.bf16 %v2667_v10, %v2667_v10 }
 0x61c   :  { %1151 = vmatmul.mubr.bf16.vlgmr.msra.gmra.mxu0 %v1117_v13  ;;  %1839 = vmatmul.mubr.bf16.vlgmr.msra.gmra.mxu1 %v1117_v13 }
 0x61d   :  { %1222 = vmatpush1.bf16.msra.mxu0 %v2603_v16  ;;  %1843 = vmatpush3.bf16.msra.mxu1 %v2032_v7 }
 0x61e   :  { %1223 = vmatprep.subr.bf16.mxu0 %v2610_v19  ;;  %1844 = vmatprep.subr.bf16.mxu1 %v2855_v8 }
 0x61f   :  { %1253 = vmatprep.mubr.bf16.mxu0 %v2856_v27  ;;  %1858 = vmatprep.mubr.msk.bf16.mxu1 %vm2073_vm1, %v2855_v8  ;;  %v2034_v27 = vld [vmem:[%s2842_s3 + $0x80] ss:$12 sps:$4 sm:$0xff]  }
 0x621   :  { %1224 = vmatpush1.bf16.msra.mxu0 %v2620_v63  ;;  %1845 = vmatpush3.bf16.msra.mxu1 %v2033_v57 }
 0x622   :  { %1225 = vmatprep.subr.bf16.mxu0 %v2627_v33  ;;  %1846 = vmatprep.subr.bf16.mxu1 %v2855_v8 }
 0x625   :  { %1226 = vmatpush1.bf16.msra.mxu0 %v2634_v53  ;;  %1847 = vmatpush3.bf16.msra.mxu1 %v2034_v27 }
 0x626   :  { %1227 = vmatprep.subr.bf16.mxu0 %v2035_v56  ;;  %1848 = vmatprep.subr.bf16.mxu1 %v2855_v8 }
 0x629   :  { %1228 = vmatpush1.bf16.msra.mxu0 %v2036_v59  ;;  %1849 = vmatpush3.bf16.msra.mxu1 %v2037_v5 }
 0x62a   :  { %1229 = vmatprep.subr.bf16.mxu0 %v2038_v3  ;;  %1850 = vmatprep.subr.bf16.mxu1 %v2855_v8 }
 0x62d   :  { %1230 = vmatpush1.bf16.msra.mxu0 %v2039_v14  ;;  %1851 = vmatpush3.bf16.msra.mxu1 %v2298_v47  ;;  %v2043_v47 = vld [vmem:[%s2842_s3 + $0x18] ss:$12 sps:$4 sm:$0xff]   ;;  %v2857_v14 = vld [vmem:[#allocation5_spill] sm:$0xff] }
 0x62e   :  { %1231 = vmatprep.subr.bf16.mxu0 %v2040_v62  ;;  %1852 = vmatprep.subr.bf16.mxu1 %v2855_v8 }
 0x631   :  { %1232 = vmatpush1.bf16.msra.mxu0 %v2041_v2  ;;  %1853 = vmatpush3.bf16.msra.mxu1 %v2311_v49  ;;  %v2045_v49 = vld [vmem:[%s2842_s3] ss:$12 sps:$4 sm:$0xff]  }
 0x632   :  { %1233 = vmatprep.subr.bf16.mxu0 %v2042_v12  ;;  %1854 = vmatprep.subr.bf16.mxu1 %v2855_v8 }
 0x635   :  { %1234 = vmatpush1.bf16.msra.mxu0 %v2043_v47  ;;  %1855 = vmatpush3.bf16.msra.mxu1 %v2324_v50 }
 0x636   :  { %1235 = vmatprep.subr.bf16.mxu0 %v2044_v18  ;;  %1856 = vmatprep.subr.bf16.mxu1 %v2855_v8 }
 0x639   :  { %1236 = vmatpush1.bf16.msra.mxu0 %v2045_v49  ;;  %1857 = vmatpush3.bf16.msra.mxu1 %v2333_v51 }
 0x63a   :  { %1862 = vmatprep.subr.mxu0 %v2855_v8  ;;  %1897 = vmatprep.subr.mxu1 %v2855_v8 }
 0x6dc   :  { %v1152_v58 = vpop.f32.mrf.mxu0  ;;  %v1207_v50 = vpop.f32.mrf.mxu1 }
 0x6dd   :  { %v1159_v61 = vadd.f32 %v1152_v58, %v2396_v45  ;;  %v1208_v26 = vadd.f32 %v2417_v28, %v1207_v50 }
 0x6de   :  { %v1154_v32 = vpop.f32.mrf.mxu0  ;;  %v1840_v4 = vpop.f32.mrf.mxu1 }
 0x6df   :  { %v1563_v23 = vmul.f32 -1.442695, %v1159_v61  ;;  %v1166_v16 = vadd.f32 %v1154_v32, %v2400_v55  ;;  %v2858_v61 = vld [vmem:[#allocation6_spill] sm:$0xff] }
 0x6e0   :  { %v1156_v1 = vpop.f32.mrf.mxu0  ;;  %v1210_v21 = vpop.f32.mrf.mxu1 }
 0x6e1   :  { %2006 = vpow2.f32 %v1563_v23  ;;  %v1564_v19 = vmul.f32 -1.442695, %v1166_v16 }
 0x6e2   :  { %v1157_v9 = vpop.f32.mrf.mxu0  ;;  %v1841_v52 = vpop.f32.mrf.mxu1 }
 0x6e3   :  { %2008 = vpow2.f32 %v1564_v19  ;;  %v1420_v19 = vld [vmem:[%s2846_s7 + $0x10] sm:$0xff] }
 0x6ee   :  { %v2007_v51 = vpop.eup %2006 }
 0x6ef   :  { %v1163_v63 = vadd.f32 1.0, %v2007_v51  ;;  %v1418_v51 = vld [vmem:[%s2846_s7] sm:$0xff] }
 0x6f0   :  { %v2009_v33 = vpop.eup %2008 }
 0x6f1   :  { %2010 = vrcp.f32 %v1163_v63  ;;  %v1170_v53 = vadd.f32 1.0, %v2009_v33  ;;  %v1567_v63 = vld [vmem:[%s2845_s6] ss:$0 sm:$0xff] }
 0x6f3   :  { %2012 = vrcp.f32 %v1170_v53 }
 0x6fe   :  { %v2011_v45 = vpop.eup %2010 }
 0x6ff   :  { %v1213_v29 = vmul.f32 %v2011_v45, %v1208_v26 }
 0x700   :  { %v2013_v34 = vpop.eup %2012 }
 0x701   :  { %v1214_v31 = vadd.f32 %v1213_v29, %v2412_v48  ;;  %v1216_v35 = vsub.f32 1.0, %v2013_v34  ;;  %v1218_v55 = vmul.f32 %v2013_v34, %v2667_v10  ;;  %v1339_v48 = vld [vmem:[%s2844_s5 + $0x78] sm:$0xff]  ;;  %v1568_v29 = vld [vmem:[%s2847_s8] ss:$0 sm:$0xff] }
 0x703   :  { %2014 = vtanh.f32 %v1214_v31 }
 0x710   :  { %v2015_v36 = vpop.eup %2014 }
 0x711   :  { %v1217_v38 = vmul.f32 %v2015_v36, %v1216_v35 }
 0x713   :  { %v2739_v39 = vadd.f32 %v1218_v55, %v1217_v38 }
 0x715   :  { %v1220_v40 = vpack.c.bf16 %v2739_v39, %v2739_v39 }
 0x717   :  { %1254 = vmatmul.mubr.bf16.vlgmr.msra.gmra.mxu0 %v1220_v40  ;;  %1859 = vmatmul.mubr.bf16.vlgmr.msra.gmra.mxu1 %v1220_v40 }
 0x718   :  { %1894 = vmatprep.mubr.msk.f32.mxu0 %vm2073_vm1, %v2855_v8  ;;  %1905 = vmatprep.mubr.msk.f32.mxu1 %vm2073_vm1, %v2855_v8 }
 0x719   :  { %1863 = vmatpush3.msra.mxu0 %v1339_v48  ;;  %1898 = vmatpush3.msra.mxu1 %v1421_v41 }
 0x71a   :  { %1864 = vmatprep.subr.mxu0 %v2855_v8  ;;  %1899 = vmatprep.subr.mxu1 %v2855_v8 }
 0x71b   :  { %1865 = vmatpush3.msra.mxu0 %v1338_v42  ;;  %1900 = vmatpush3.msra.mxu1 %v1420_v19 }
 0x71c   :  { %1866 = vmatprep.subr.mxu0 %v2855_v8  ;;  %1901 = vmatprep.subr.mxu1 %v2855_v8 }
 0x71d   :  { %1867 = vmatpush3.msra.mxu0 %v1337_v43 }
 0x71e   :  { %1868 = vmatprep.subr.mxu0 %v2855_v8 }
 0x71f   :  { %1869 = vmatpush3.msra.mxu0 %v1336_v44 }
 0x720   :  { %1870 = vmatprep.subr.mxu0 %v2855_v8 }
 0x721   :  { %1871 = vmatpush3.msra.mxu0 %v1335_v46 }
 0x722   :  { %1872 = vmatprep.subr.mxu0 %v2855_v8 }
 0x723   :  { %1873 = vmatpush3.msra.mxu0 %v1334_v6 }
 0x724   :  { %1874 = vmatprep.subr.mxu0 %v2855_v8 }
 0x725   :  { %1875 = vmatpush3.msra.mxu0 %v1333_v0 }
 0x726   :  { %1876 = vmatprep.subr.mxu0 %v2855_v8 }
 0x727   :  { %1877 = vmatpush3.msra.mxu0 %v1332_v11 }
 0x728   :  { %1878 = vmatprep.subr.mxu0 %v2855_v8 }
 0x729   :  { %1879 = vmatpush3.msra.mxu0 %v1331_v54 }
 0x72a   :  { %1880 = vmatprep.subr.mxu0 %v2855_v8 }
 0x72b   :  { %1881 = vmatpush3.msra.mxu0 %v1330_v37 }
 0x72c   :  { %1882 = vmatprep.subr.mxu0 %v2855_v8 }
 0x72d   :  { %1883 = vmatpush3.msra.mxu0 %v1329_v24 }
 0x72e   :  { %1884 = vmatprep.subr.mxu0 %v2855_v8 }
 0x72f   :  { %1885 = vmatpush3.msra.mxu0 %v1328_v15 }
 0x730   :  { %1886 = vmatprep.subr.mxu0 %v2855_v8 }
 0x731   :  { %1887 = vmatpush3.msra.mxu0 %v1327_v17 }
 0x732   :  { %1888 = vmatprep.subr.mxu0 %v2855_v8 }
 0x733   :  { %1889 = vmatpush3.msra.mxu0 %v1326_v20 }
 0x734   :  { %1890 = vmatprep.subr.mxu0 %v2855_v8 }
 0x735   :  { %1891 = vmatpush3.msra.mxu0 %v1325_v22 }
 0x736   :  { %1892 = vmatprep.subr.mxu0 %v2855_v8 }
 0x737   :  { %1893 = vmatpush3.msra.mxu0 %v1324_v25 }
 0x7d7   :  { %v1255_v30 = vpop.f32.mrf.mxu0  ;;  %v1310_v10 = vpop.f32.mrf.mxu1 }
 0x7d8   :  { %v1262_v13 = vadd.f32 %v1255_v30, %v2402_v60  ;;  %v1311_v58 = vadd.f32 %v2417_v28, %v1310_v10  ;;  %v1419_v28 = vld [vmem:[%s2846_s7 + $0x8] sm:$0xff] }
 0x7d9   :  { %v1257_v7 = vpop.f32.mrf.mxu0  ;;  %v1860_v57 = vpop.f32.mrf.mxu1  ;;  %1902 = vmatpush3.msra.mxu1 %v1419_v28 }
 0x7da   :  { %v1565_v27 = vmul.f32 -1.442695, %v1262_v13  ;;  %v1269_v62 = vadd.f32 %v1257_v7, %v2857_v14  ;;  %1903 = vmatprep.subr.mxu1 %v2855_v8 }
 0x7db   :  { %v1259_v56 = vpop.f32.mrf.mxu0  ;;  %v1313_v59 = vpop.f32.mrf.mxu1  ;;  %1904 = vmatpush3.msra.mxu1 %v1418_v51 }
 0x7dc   :  { %2016 = vpow2.f32 %v1565_v27  ;;  %v1566_v2 = vmul.f32 -1.442695, %v1269_v62 }
 0x7dd   :  { %v1260_v5 = vpop.f32.mrf.mxu0  ;;  %v1861_v3 = vpop.f32.mrf.mxu1 }
 0x7de   :  { %2018 = vpow2.f32 %v1566_v2 }
 0x7e9   :  { %v2017_v12 = vpop.eup %2016 }
 0x7ea   :  { %v1266_v47 = vadd.f32 1.0, %v2017_v12 }
 0x7eb   :  { %v2019_v18 = vpop.eup %2018 }
 0x7ec   :  { %2020 = vrcp.f32 %v1266_v47  ;;  %v1273_v49 = vadd.f32 1.0, %v2019_v18 }
 0x7ee   :  { %2022 = vrcp.f32 %v1273_v49 }
 0x7f9   :  { %v2021_v60 = vpop.eup %2020 }
 0x7fa   :  { %v1316_v50 = vmul.f32 %v2021_v60, %v1311_v58 }
 0x7fb   :  { %v2023_v4 = vpop.eup %2022 }
 0x7fc   :  { %v1317_v32 = vadd.f32 %v1316_v50, %v2858_v61  ;;  %v1319_v23 = vsub.f32 1.0, %v2023_v4  ;;  %v1321_v9 = vmul.f32 %v2023_v4, %v2739_v39 }
 0x7fe   :  { %2024 = vtanh.f32 %v1317_v32 }
 0x80b   :  { %v2025_v1 = vpop.eup %2024 }
 0x80c   :  { %v1320_v21 = vmul.f32 %v2025_v1, %v1319_v23 }
 0x80e   :  { %v1322_v52 = vadd.f32 %v1321_v9, %v1320_v21 }
 0x810   :  { %v1323_v16 = vmax.f32 %v1322_v52, 0.0 }
 0x812   :  { %1895 = vmatmul.mubr.f32.vlgmr.msra.gmra.mxu0 %v1323_v16 }
 0x8d2   :  { %v1413_v33 = vpop.f32.mrf.mxu0 }
 0x8d3   :  { %v1414_v53 = vadd.f32 %v1567_v63, %v1413_v33 }
 0x8d4   :  { %v1896_v26 = vpop.f32.mrf.mxu0 }
 0x8d5   :  { %v1417_v45 = vmax.f32 %v1414_v53, 0.0 }
 0x8d7   :  { %1906 = vmatmul.mubr.msk.f32.vlgmr.msra.gmra.mxu1 %vm1429_vm2, %v1417_v45 }
 0x997   :  { %v1499_v8 = vpop.f32.mrf.mxu1 }
 0x998   :  { %v1500_v31 = vadd.f32 %v1568_v29, %v1499_v8 }
 0x999   :  { %v1907_v34 = vpop.f32.mrf.mxu1 }
 0x99a   :  { %1504 = vst.msk [vmem:[%s2848_s9] sm:$0xff] %vm1503_vm3, %v1500_v31 }
 0x99b   :  { %1509 = vsyncpa [#allocation3], 1 }

</bundles_post_ra>
